<compile_context>
chip_gen: v6e
topology: v6e:2x2x1
jax: 0.10.0
libtpu: 0.0.40
codegen_flags: <defaults>
</compile_context>

<pallas_src>
import jax
import jax.numpy as jnp
from jax.experimental import pallas as pl
from jax.experimental.pallas import tpu as pltpu


def lstm_kernel(x_ref, wbig_ref, whh_ref, bbig_ref, y_ref):
    """One batch-shard of a single-layer LSTM, whole sequence inside one grid step.

    x_ref   : (bb, seq*in)            VMEM  batch-major packed inputs (contiguous DMA)
    wbig_ref: (seq*in, seq*4H)        VMEM  block-diag(W_ih^T), gate order [i,f,o,g]
    whh_ref : (H, 4H)                 VMEM  W_hh^T, gate order [i,f,o,g]
    bbig_ref: (1, seq*4H)             VMEM  (b_ih + b_hh) tiled over time
    y_ref   : (bb, (seq+1)*H)         VMEM  packed outputs: [h_0 | ... | h_{seq-1} | c_n]
    """
    bb = x_ref.shape[0]
    hidden, gdim = whh_ref.shape                       # H, 4H
    seq = bbig_ref.shape[1] // gdim

    # Hoist all weight loads/broadcasts out of the recurrence (JAX does not CSE these).
    whh = whh_ref[...]                                 # (H, 4H)
    whh_rows = [jnp.broadcast_to(whh[k:k + 1, :], (bb, gdim)) for k in range(hidden)]

    # Input projection + bias for the whole chunk in ONE matmul (off the serial path).
    xproj = jnp.dot(x_ref[...], wbig_ref[...],
                    preferred_element_type=jnp.float32) + bbig_ref[...]   # (bb, seq*4H)

    h = jnp.zeros((bb, hidden), jnp.float32)
    c = jnp.zeros((bb, hidden), jnp.float32)

    chunk_steps = max(1, 128 // hidden)   # flush y every 128 output lanes (unmasked vst)
    chunk, chunk_start = [], 0

    # Static trip count -> fully unrolled so the LLO scheduler sees across iterations.
    for t in range(seq):
        # Recurrent projection as VPU FMAs on one (bb, 4H) region; balanced tree
        # reduction: depth ceil(log2 H) = 3 dependent adds instead of H-1 = 7.
        terms = [h[:, k:k + 1] * whh_rows[k] for k in range(hidden)]
        while len(terms) > 1:
            nxt = [terms[i] + terms[i + 1] for i in range(0, len(terms) - 1, 2)]
            if len(terms) % 2:
                nxt.append(terms[-1])
            terms = nxt

        gates = xproj[:, t * gdim:(t + 1) * gdim] + terms[0]   # (bb, 4H), [i, f, o, g]

        sig = jax.nn.sigmoid(gates[:, :3 * hidden])            # one EUP region: i, f, o
        i_g = sig[:, 0 * hidden:1 * hidden]
        f_g = sig[:, 1 * hidden:2 * hidden]
        o_g = sig[:, 2 * hidden:3 * hidden]
        g_g = jnp.tanh(gates[:, 3 * hidden:])                  # one EUP region: g

        c = f_g * c + i_g * g_g
        h = o_g * jnp.tanh(c)

        chunk.append(h)
        if len(chunk) == chunk_steps or t == seq - 1:
            val = chunk[0] if len(chunk) == 1 else jnp.concatenate(chunk, axis=-1)
            y_ref[:, chunk_start * hidden:(t + 1) * hidden] = val
            chunk, chunk_start = [], t + 1

    # Final cell state folded into the packed slab (h_n == last timestep's h block).
    y_ref[:, seq * hidden:] = c


def lstm_forward(x, w_ih, w_hh, b_ih, b_hh, *, batch_block=8, min_grid_steps=2):
    """x: (seq, batch, input) f32. Weights in PyTorch layout:
       w_ih: (4*hidden, input), w_hh: (4*hidden, hidden), biases: (4*hidden,).
       Returns (y, h_n, c_n) matching torch.nn.LSTM with zero initial state."""
    seq, batch, in_dim = x.shape
    hidden = w_hh.shape[1]
    gdim = 4 * hidden

    # Permute PyTorch gate order [i, f, g, o] -> [i, f, o, g] (contiguous sigmoid/tanh).
    def permute_gates(w):
        i, f, g, o = jnp.split(jnp.asarray(w, jnp.float32), 4, axis=0)
        return jnp.concatenate([i, f, o, g], axis=0)

    wih_g = permute_gates(w_ih)                                   # (4H, in)
    whh_t = permute_gates(w_hh).T                                 # (H, 4H)
    b_g = permute_gates(b_ih) + permute_gates(b_hh)               # (4H,)

    # Block-diagonal W_ih^T so the whole-chunk input projection is a single matmul on
    # the packed batch-major x layout; bias tiled over time to match.
    wbig = jnp.kron(jnp.eye(seq, dtype=jnp.float32), wih_g.T)     # (seq*in, seq*4H)
    bbig = jnp.tile(b_g[None, :], (1, seq))                       # (1, seq*4H)

    # Batch padded to >= min_grid_steps shards of batch_block sublanes so the
    # "parallel" grid axis can be split across both TensorCores on v7x.
    bb = batch_block
    n_shards = max(min_grid_steps, pl.cdiv(batch, bb))
    batch_pad = n_shards * bb

    # Lane-packed batch-major x: (batch_pad, seq*in) -> one contiguous DMA per shard.
    x_pk = jnp.zeros((batch_pad, seq * in_dim), jnp.float32)
    x_pk = x_pk.at[:batch].set(
        jnp.asarray(x, jnp.float32).transpose(1, 0, 2).reshape(batch, seq * in_dim))

    # Explicit scoped-VMEM limit: the per-step working set (double-buffered x tile,
    # weights, xproj, output slab) is tiny here, but keep the budget explicit so the
    # same kernel stays inside v7x (64 MiB phys / 32 MiB scoped) and v5e (16 MiB
    # default scoped) when seq grows.
    vmem_limit = 32 * 1024 * 1024

    y_pk = pl.pallas_call(
        lstm_kernel,
        out_shape=jax.ShapeDtypeStruct((batch_pad, (seq + 1) * hidden), jnp.float32),
        grid=(n_shards,),
        in_specs=[
            pl.BlockSpec((bb, seq * in_dim), lambda i: (i, 0)),
            pl.BlockSpec((seq * in_dim, seq * gdim), lambda i: (0, 0)),
            pl.BlockSpec((hidden, gdim), lambda i: (0, 0)),
            pl.BlockSpec((1, seq * gdim), lambda i: (0, 0)),
        ],
        out_specs=pl.BlockSpec((bb, (seq + 1) * hidden), lambda i: (i, 0)),
        compiler_params=pltpu.CompilerParams(
            dimension_semantics=("parallel",),
            vmem_limit_bytes=vmem_limit),
    )(x_pk, wbig, whh_t, bbig)

    # Unpack: (batch_pad, (seq+1)*H) -> y (seq, batch, H), h_n = last step, c_n = tail.
    y = y_pk[:batch, :seq * hidden].reshape(batch, seq, hidden).transpose(1, 0, 2)
    h_n = y[-1][None]                                             # (1, batch, H)
    c_n = y_pk[:batch, seq * hidden:][None]                       # (1, batch, H)
    return y, h_n, c_n


def lstm_reference(x, w_ih, w_hh, b_ih, b_hh):
    """Pure-JAX reference mirroring torch.nn.LSTM semantics (zero initial state)."""
    seq, batch, _ = x.shape
    hidden = w_hh.shape[1]
    h = jnp.zeros((batch, hidden), jnp.float32)
    c = jnp.zeros((batch, hidden), jnp.float32)
    ys = []
    for t in range(seq):
        gates = x[t] @ w_ih.T + b_ih + h @ w_hh.T + b_hh
        i_g = jax.nn.sigmoid(gates[:, 0 * hidden:1 * hidden])
        f_g = jax.nn.sigmoid(gates[:, 1 * hidden:2 * hidden])
        g_g = jnp.tanh(gates[:, 2 * hidden:3 * hidden])
        o_g = jax.nn.sigmoid(gates[:, 3 * hidden:4 * hidden])
        c = f_g * c + i_g * g_g
        h = o_g * jnp.tanh(c)
        ys.append(h)
    return jnp.stack(ys, 0), h[None], c[None]


if __name__ == "__main__":
    SEQ, BATCH, INPUT, HIDDEN = 8, 2, 4, 8

    key = jax.random.PRNGKey(0)
    kx, k1, k2, k3, k4 = jax.random.split(key, 5)
    # Deterministic parameter init (same scale as PyTorch: U(-1/sqrt(H), 1/sqrt(H))).
    scale = 1.0 / jnp.sqrt(jnp.float32(HIDDEN))
    x = jax.random.normal(kx, (SEQ, BATCH, INPUT), jnp.float32)
    w_ih = jax.random.uniform(k1, (4 * HIDDEN, INPUT), jnp.float32, -scale, scale)
    w_hh = jax.random.uniform(k2, (4 * HIDDEN, HIDDEN), jnp.float32, -scale, scale)
    b_ih = jax.random.uniform(k3, (4 * HIDDEN,), jnp.float32, -scale, scale)
    b_hh = jax.random.uniform(k4, (4 * HIDDEN,), jnp.float32, -scale, scale)

    y, h_n, c_n = lstm_forward(x, w_ih, w_hh, b_ih, b_hh)
    jax.block_until_ready((y, h_n, c_n))

    y_ref, h_ref, c_ref = lstm_reference(x, w_ih, w_hh, b_ih, b_hh)
    assert jnp.allclose(y, y_ref, atol=1e-5), "output mismatch"
    assert jnp.allclose(h_n, h_ref, atol=1e-5), "h_n mismatch"
    assert jnp.allclose(c_n, c_ref, atol=1e-5), "c_n mismatch"

    print("KERNEL_OK")
</pallas_src>

<mosaic_0001>
module attributes {stable_mosaic.version = 11 : i64} {
  func.func @lstm_kernel(%arg0: i32, %arg1: memref<8x32xf32, #tpu.memory_space<vmem>>, %arg2: memref<32x256xf32, #tpu.memory_space<vmem>>, %arg3: memref<8x32xf32, #tpu.memory_space<vmem>>, %arg4: memref<1x256xf32, #tpu.memory_space<vmem>>, %arg5: memref<8x72xf32, #tpu.memory_space<vmem>>) attributes {dimension_semantics = [#tpu.dimension_semantics<parallel>], iteration_bounds = array<i64: 2>, scalar_prefetch = 0 : i64, scratch_operands = 0 : i64, tpu.core_type = #tpu.core_type<tc>, window_params = [{transform_indices = @transform_0, window_bounds = array<i64: 8, 32>}, {pipeline_mode = #tpu.pipeline_mode<synchronous>, transform_indices = @transform_1, window_bounds = array<i64: 32, 256>}, {pipeline_mode = #tpu.pipeline_mode<synchronous>, transform_indices = @transform_2, window_bounds = array<i64: 8, 32>}, {pipeline_mode = #tpu.pipeline_mode<synchronous>, transform_indices = @transform_3, window_bounds = array<i64: 1, 256>}, {transform_indices = @transform_4, window_bounds = array<i64: 8, 72>}]} {
    %c0 = arith.constant 0 : index
    %c0_0 = arith.constant 0 : index
    %0 = vector.load %arg3[%c0, %c0_0] : memref<8x32xf32, #tpu.memory_space<vmem>>, vector<8x32xf32>
    %1 = vector.extract_strided_slice %0 {offsets = [0, 0], sizes = [1, 32], strides = [1, 1]} : vector<8x32xf32> to vector<1x32xf32>
    %2 = vector.shape_cast %1 : vector<1x32xf32> to vector<1x32xf32>
    %3 = vector.broadcast %2 : vector<1x32xf32> to vector<8x32xf32>
    %4 = vector.extract_strided_slice %0 {offsets = [1, 0], sizes = [1, 32], strides = [1, 1]} : vector<8x32xf32> to vector<1x32xf32>
    %5 = vector.shape_cast %4 : vector<1x32xf32> to vector<1x32xf32>
    %6 = vector.broadcast %5 : vector<1x32xf32> to vector<8x32xf32>
    %7 = vector.extract_strided_slice %0 {offsets = [2, 0], sizes = [1, 32], strides = [1, 1]} : vector<8x32xf32> to vector<1x32xf32>
    %8 = vector.shape_cast %7 : vector<1x32xf32> to vector<1x32xf32>
    %9 = vector.broadcast %8 : vector<1x32xf32> to vector<8x32xf32>
    %10 = vector.extract_strided_slice %0 {offsets = [3, 0], sizes = [1, 32], strides = [1, 1]} : vector<8x32xf32> to vector<1x32xf32>
    %11 = vector.shape_cast %10 : vector<1x32xf32> to vector<1x32xf32>
    %12 = vector.broadcast %11 : vector<1x32xf32> to vector<8x32xf32>
    %13 = vector.extract_strided_slice %0 {offsets = [4, 0], sizes = [1, 32], strides = [1, 1]} : vector<8x32xf32> to vector<1x32xf32>
    %14 = vector.shape_cast %13 : vector<1x32xf32> to vector<1x32xf32>
    %15 = vector.broadcast %14 : vector<1x32xf32> to vector<8x32xf32>
    %16 = vector.extract_strided_slice %0 {offsets = [5, 0], sizes = [1, 32], strides = [1, 1]} : vector<8x32xf32> to vector<1x32xf32>
    %17 = vector.shape_cast %16 : vector<1x32xf32> to vector<1x32xf32>
    %18 = vector.broadcast %17 : vector<1x32xf32> to vector<8x32xf32>
    %19 = vector.extract_strided_slice %0 {offsets = [6, 0], sizes = [1, 32], strides = [1, 1]} : vector<8x32xf32> to vector<1x32xf32>
    %20 = vector.shape_cast %19 : vector<1x32xf32> to vector<1x32xf32>
    %21 = vector.broadcast %20 : vector<1x32xf32> to vector<8x32xf32>
    %22 = vector.extract_strided_slice %0 {offsets = [7, 0], sizes = [1, 32], strides = [1, 1]} : vector<8x32xf32> to vector<1x32xf32>
    %23 = vector.shape_cast %22 : vector<1x32xf32> to vector<1x32xf32>
    %24 = vector.broadcast %23 : vector<1x32xf32> to vector<8x32xf32>
    %c0_1 = arith.constant 0 : index
    %c0_2 = arith.constant 0 : index
    %25 = vector.load %arg1[%c0_1, %c0_2] : memref<8x32xf32, #tpu.memory_space<vmem>>, vector<8x32xf32>
    %c0_3 = arith.constant 0 : index
    %c0_4 = arith.constant 0 : index
    %26 = vector.load %arg2[%c0_3, %c0_4] : memref<32x256xf32, #tpu.memory_space<vmem>>, vector<32x256xf32>
    %cst = arith.constant dense<0.000000e+00> : vector<8x256xf32>
    %27 = tpu.matmul %25, %26, %cst {dimension_numbers = #tpu.dot_dimension_numbers<[1], [0], [0], [1], [0, 0, 1, 1], [], []>} : vector<8x32xf32>, vector<32x256xf32>, vector<8x256xf32> -> vector<8x256xf32>
    %c0_5 = arith.constant 0 : index
    %c0_6 = arith.constant 0 : index
    %28 = vector.load %arg4[%c0_5, %c0_6] : memref<1x256xf32, #tpu.memory_space<vmem>>, vector<1x256xf32>
    %29 = vector.broadcast %28 : vector<1x256xf32> to vector<8x256xf32>
    %30 = arith.addf %27, %29 : vector<8x256xf32>
    %cst_7 = arith.constant 0.000000e+00 : f32
    %31 = vector.broadcast %cst_7 : f32 to vector<8x8xf32>
    %cst_8 = arith.constant 0.000000e+00 : f32
    %32 = vector.broadcast %cst_8 : f32 to vector<8x8xf32>
    %33 = vector.extract_strided_slice %31 {offsets = [0, 0], sizes = [8, 1], strides = [1, 1]} : vector<8x8xf32> to vector<8x1xf32>
    %34 = vector.broadcast %33 : vector<8x1xf32> to vector<8x32xf32>
    %35 = arith.mulf %34, %3 : vector<8x32xf32>
    %36 = vector.extract_strided_slice %31 {offsets = [0, 1], sizes = [8, 1], strides = [1, 1]} : vector<8x8xf32> to vector<8x1xf32>
    %37 = vector.broadcast %36 : vector<8x1xf32> to vector<8x32xf32>
    %38 = arith.mulf %37, %6 : vector<8x32xf32>
    %39 = vector.extract_strided_slice %31 {offsets = [0, 2], sizes = [8, 1], strides = [1, 1]} : vector<8x8xf32> to vector<8x1xf32>
    %40 = vector.broadcast %39 : vector<8x1xf32> to vector<8x32xf32>
    %41 = arith.mulf %40, %9 : vector<8x32xf32>
    %42 = vector.extract_strided_slice %31 {offsets = [0, 3], sizes = [8, 1], strides = [1, 1]} : vector<8x8xf32> to vector<8x1xf32>
    %43 = vector.broadcast %42 : vector<8x1xf32> to vector<8x32xf32>
    %44 = arith.mulf %43, %12 : vector<8x32xf32>
    %45 = vector.extract_strided_slice %31 {offsets = [0, 4], sizes = [8, 1], strides = [1, 1]} : vector<8x8xf32> to vector<8x1xf32>
    %46 = vector.broadcast %45 : vector<8x1xf32> to vector<8x32xf32>
    %47 = arith.mulf %46, %15 : vector<8x32xf32>
    %48 = vector.extract_strided_slice %31 {offsets = [0, 5], sizes = [8, 1], strides = [1, 1]} : vector<8x8xf32> to vector<8x1xf32>
    %49 = vector.broadcast %48 : vector<8x1xf32> to vector<8x32xf32>
    %50 = arith.mulf %49, %18 : vector<8x32xf32>
    %51 = vector.extract_strided_slice %31 {offsets = [0, 6], sizes = [8, 1], strides = [1, 1]} : vector<8x8xf32> to vector<8x1xf32>
    %52 = vector.broadcast %51 : vector<8x1xf32> to vector<8x32xf32>
    %53 = arith.mulf %52, %21 : vector<8x32xf32>
    %54 = vector.extract_strided_slice %31 {offsets = [0, 7], sizes = [8, 1], strides = [1, 1]} : vector<8x8xf32> to vector<8x1xf32>
    %55 = vector.broadcast %54 : vector<8x1xf32> to vector<8x32xf32>
    %56 = arith.mulf %55, %24 : vector<8x32xf32>
    %57 = arith.addf %35, %38 : vector<8x32xf32>
    %58 = arith.addf %41, %44 : vector<8x32xf32>
    %59 = arith.addf %47, %50 : vector<8x32xf32>
    %60 = arith.addf %53, %56 : vector<8x32xf32>
    %61 = arith.addf %57, %58 : vector<8x32xf32>
    %62 = arith.addf %59, %60 : vector<8x32xf32>
    %63 = arith.addf %61, %62 : vector<8x32xf32>
    %64 = vector.extract_strided_slice %30 {offsets = [0, 0], sizes = [8, 32], strides = [1, 1]} : vector<8x256xf32> to vector<8x32xf32>
    %65 = arith.addf %64, %63 : vector<8x32xf32>
    %66 = vector.extract_strided_slice %65 {offsets = [0, 0], sizes = [8, 24], strides = [1, 1]} : vector<8x32xf32> to vector<8x24xf32>
    %67 = arith.negf %66 : vector<8x24xf32>
    %68 = math.exp %67 : vector<8x24xf32>
    %cst_9 = arith.constant 1.000000e+00 : f32
    %69 = vector.broadcast %cst_9 : f32 to vector<8x24xf32>
    %70 = arith.addf %69, %68 : vector<8x24xf32>
    %71 = arith.divf %69, %70 : vector<8x24xf32>
    %72 = vector.extract_strided_slice %71 {offsets = [0, 0], sizes = [8, 8], strides = [1, 1]} : vector<8x24xf32> to vector<8x8xf32>
    %73 = vector.extract_strided_slice %71 {offsets = [0, 8], sizes = [8, 8], strides = [1, 1]} : vector<8x24xf32> to vector<8x8xf32>
    %74 = vector.extract_strided_slice %71 {offsets = [0, 16], sizes = [8, 8], strides = [1, 1]} : vector<8x24xf32> to vector<8x8xf32>
    %75 = vector.extract_strided_slice %65 {offsets = [0, 24], sizes = [8, 8], strides = [1, 1]} : vector<8x32xf32> to vector<8x8xf32>
    %76 = math.tanh %75 : vector<8x8xf32>
    %77 = arith.mulf %73, %32 : vector<8x8xf32>
    %78 = arith.mulf %72, %76 : vector<8x8xf32>
    %79 = arith.addf %77, %78 : vector<8x8xf32>
    %80 = math.tanh %79 : vector<8x8xf32>
    %81 = arith.mulf %74, %80 : vector<8x8xf32>
    %82 = vector.extract_strided_slice %81 {offsets = [0, 0], sizes = [8, 1], strides = [1, 1]} : vector<8x8xf32> to vector<8x1xf32>
    %83 = vector.broadcast %82 : vector<8x1xf32> to vector<8x32xf32>
    %84 = arith.mulf %83, %3 : vector<8x32xf32>
    %85 = vector.extract_strided_slice %81 {offsets = [0, 1], sizes = [8, 1], strides = [1, 1]} : vector<8x8xf32> to vector<8x1xf32>
    %86 = vector.broadcast %85 : vector<8x1xf32> to vector<8x32xf32>
    %87 = arith.mulf %86, %6 : vector<8x32xf32>
    %88 = vector.extract_strided_slice %81 {offsets = [0, 2], sizes = [8, 1], strides = [1, 1]} : vector<8x8xf32> to vector<8x1xf32>
    %89 = vector.broadcast %88 : vector<8x1xf32> to vector<8x32xf32>
    %90 = arith.mulf %89, %9 : vector<8x32xf32>
    %91 = vector.extract_strided_slice %81 {offsets = [0, 3], sizes = [8, 1], strides = [1, 1]} : vector<8x8xf32> to vector<8x1xf32>
    %92 = vector.broadcast %91 : vector<8x1xf32> to vector<8x32xf32>
    %93 = arith.mulf %92, %12 : vector<8x32xf32>
    %94 = vector.extract_strided_slice %81 {offsets = [0, 4], sizes = [8, 1], strides = [1, 1]} : vector<8x8xf32> to vector<8x1xf32>
    %95 = vector.broadcast %94 : vector<8x1xf32> to vector<8x32xf32>
    %96 = arith.mulf %95, %15 : vector<8x32xf32>
    %97 = vector.extract_strided_slice %81 {offsets = [0, 5], sizes = [8, 1], strides = [1, 1]} : vector<8x8xf32> to vector<8x1xf32>
    %98 = vector.broadcast %97 : vector<8x1xf32> to vector<8x32xf32>
    %99 = arith.mulf %98, %18 : vector<8x32xf32>
    %100 = vector.extract_strided_slice %81 {offsets = [0, 6], sizes = [8, 1], strides = [1, 1]} : vector<8x8xf32> to vector<8x1xf32>
    %101 = vector.broadcast %100 : vector<8x1xf32> to vector<8x32xf32>
    %102 = arith.mulf %101, %21 : vector<8x32xf32>
    %103 = vector.extract_strided_slice %81 {offsets = [0, 7], sizes = [8, 1], strides = [1, 1]} : vector<8x8xf32> to vector<8x1xf32>
    %104 = vector.broadcast %103 : vector<8x1xf32> to vector<8x32xf32>
    %105 = arith.mulf %104, %24 : vector<8x32xf32>
    %106 = arith.addf %84, %87 : vector<8x32xf32>
    %107 = arith.addf %90, %93 : vector<8x32xf32>
    %108 = arith.addf %96, %99 : vector<8x32xf32>
    %109 = arith.addf %102, %105 : vector<8x32xf32>
    %110 = arith.addf %106, %107 : vector<8x32xf32>
    %111 = arith.addf %108, %109 : vector<8x32xf32>
    %112 = arith.addf %110, %111 : vector<8x32xf32>
    %113 = vector.extract_strided_slice %30 {offsets = [0, 32], sizes = [8, 32], strides = [1, 1]} : vector<8x256xf32> to vector<8x32xf32>
    %114 = arith.addf %113, %112 : vector<8x32xf32>
    %115 = vector.extract_strided_slice %114 {offsets = [0, 0], sizes = [8, 24], strides = [1, 1]} : vector<8x32xf32> to vector<8x24xf32>
    %116 = arith.negf %115 : vector<8x24xf32>
    %117 = math.exp %116 : vector<8x24xf32>
    %cst_10 = arith.constant 1.000000e+00 : f32
    %118 = vector.broadcast %cst_10 : f32 to vector<8x24xf32>
    %119 = arith.addf %118, %117 : vector<8x24xf32>
    %120 = arith.divf %118, %119 : vector<8x24xf32>
    %121 = vector.extract_strided_slice %120 {offsets = [0, 0], sizes = [8, 8], strides = [1, 1]} : vector<8x24xf32> to vector<8x8xf32>
    %122 = vector.extract_strided_slice %120 {offsets = [0, 8], sizes = [8, 8], strides = [1, 1]} : vector<8x24xf32> to vector<8x8xf32>
    %123 = vector.extract_strided_slice %120 {offsets = [0, 16], sizes = [8, 8], strides = [1, 1]} : vector<8x24xf32> to vector<8x8xf32>
    %124 = vector.extract_strided_slice %114 {offsets = [0, 24], sizes = [8, 8], strides = [1, 1]} : vector<8x32xf32> to vector<8x8xf32>
    %125 = math.tanh %124 : vector<8x8xf32>
    %126 = arith.mulf %122, %79 : vector<8x8xf32>
    %127 = arith.mulf %121, %125 : vector<8x8xf32>
    %128 = arith.addf %126, %127 : vector<8x8xf32>
    %129 = math.tanh %128 : vector<8x8xf32>
    %130 = arith.mulf %123, %129 : vector<8x8xf32>
    %131 = vector.extract_strided_slice %130 {offsets = [0, 0], sizes = [8, 1], strides = [1, 1]} : vector<8x8xf32> to vector<8x1xf32>
    %132 = vector.broadcast %131 : vector<8x1xf32> to vector<8x32xf32>
    %133 = arith.mulf %132, %3 : vector<8x32xf32>
    %134 = vector.extract_strided_slice %130 {offsets = [0, 1], sizes = [8, 1], strides = [1, 1]} : vector<8x8xf32> to vector<8x1xf32>
    %135 = vector.broadcast %134 : vector<8x1xf32> to vector<8x32xf32>
    %136 = arith.mulf %135, %6 : vector<8x32xf32>
    %137 = vector.extract_strided_slice %130 {offsets = [0, 2], sizes = [8, 1], strides = [1, 1]} : vector<8x8xf32> to vector<8x1xf32>
    %138 = vector.broadcast %137 : vector<8x1xf32> to vector<8x32xf32>
    %139 = arith.mulf %138, %9 : vector<8x32xf32>
    %140 = vector.extract_strided_slice %130 {offsets = [0, 3], sizes = [8, 1], strides = [1, 1]} : vector<8x8xf32> to vector<8x1xf32>
    %141 = vector.broadcast %140 : vector<8x1xf32> to vector<8x32xf32>
    %142 = arith.mulf %141, %12 : vector<8x32xf32>
    %143 = vector.extract_strided_slice %130 {offsets = [0, 4], sizes = [8, 1], strides = [1, 1]} : vector<8x8xf32> to vector<8x1xf32>
    %144 = vector.broadcast %143 : vector<8x1xf32> to vector<8x32xf32>
    %145 = arith.mulf %144, %15 : vector<8x32xf32>
    %146 = vector.extract_strided_slice %130 {offsets = [0, 5], sizes = [8, 1], strides = [1, 1]} : vector<8x8xf32> to vector<8x1xf32>
    %147 = vector.broadcast %146 : vector<8x1xf32> to vector<8x32xf32>
    %148 = arith.mulf %147, %18 : vector<8x32xf32>
    %149 = vector.extract_strided_slice %130 {offsets = [0, 6], sizes = [8, 1], strides = [1, 1]} : vector<8x8xf32> to vector<8x1xf32>
    %150 = vector.broadcast %149 : vector<8x1xf32> to vector<8x32xf32>
    %151 = arith.mulf %150, %21 : vector<8x32xf32>
    %152 = vector.extract_strided_slice %130 {offsets = [0, 7], sizes = [8, 1], strides = [1, 1]} : vector<8x8xf32> to vector<8x1xf32>
    %153 = vector.broadcast %152 : vector<8x1xf32> to vector<8x32xf32>
    %154 = arith.mulf %153, %24 : vector<8x32xf32>
    %155 = arith.addf %133, %136 : vector<8x32xf32>
    %156 = arith.addf %139, %142 : vector<8x32xf32>
    %157 = arith.addf %145, %148 : vector<8x32xf32>
    %158 = arith.addf %151, %154 : vector<8x32xf32>
    %159 = arith.addf %155, %156 : vector<8x32xf32>
    %160 = arith.addf %157, %158 : vector<8x32xf32>
    %161 = arith.addf %159, %160 : vector<8x32xf32>
    %162 = vector.extract_strided_slice %30 {offsets = [0, 64], sizes = [8, 32], strides = [1, 1]} : vector<8x256xf32> to vector<8x32xf32>
    %163 = arith.addf %162, %161 : vector<8x32xf32>
    %164 = vector.extract_strided_slice %163 {offsets = [0, 0], sizes = [8, 24], strides = [1, 1]} : vector<8x32xf32> to vector<8x24xf32>
    %165 = arith.negf %164 : vector<8x24xf32>
    %166 = math.exp %165 : vector<8x24xf32>
    %cst_11 = arith.constant 1.000000e+00 : f32
    %167 = vector.broadcast %cst_11 : f32 to vector<8x24xf32>
    %168 = arith.addf %167, %166 : vector<8x24xf32>
    %169 = arith.divf %167, %168 : vector<8x24xf32>
    %170 = vector.extract_strided_slice %169 {offsets = [0, 0], sizes = [8, 8], strides = [1, 1]} : vector<8x24xf32> to vector<8x8xf32>
    %171 = vector.extract_strided_slice %169 {offsets = [0, 8], sizes = [8, 8], strides = [1, 1]} : vector<8x24xf32> to vector<8x8xf32>
    %172 = vector.extract_strided_slice %169 {offsets = [0, 16], sizes = [8, 8], strides = [1, 1]} : vector<8x24xf32> to vector<8x8xf32>
    %173 = vector.extract_strided_slice %163 {offsets = [0, 24], sizes = [8, 8], strides = [1, 1]} : vector<8x32xf32> to vector<8x8xf32>
    %174 = math.tanh %173 : vector<8x8xf32>
    %175 = arith.mulf %171, %128 : vector<8x8xf32>
    %176 = arith.mulf %170, %174 : vector<8x8xf32>
    %177 = arith.addf %175, %176 : vector<8x8xf32>
    %178 = math.tanh %177 : vector<8x8xf32>
    %179 = arith.mulf %172, %178 : vector<8x8xf32>
    %180 = vector.extract_strided_slice %179 {offsets = [0, 0], sizes = [8, 1], strides = [1, 1]} : vector<8x8xf32> to vector<8x1xf32>
    %181 = vector.broadcast %180 : vector<8x1xf32> to vector<8x32xf32>
    %182 = arith.mulf %181, %3 : vector<8x32xf32>
    %183 = vector.extract_strided_slice %179 {offsets = [0, 1], sizes = [8, 1], strides = [1, 1]} : vector<8x8xf32> to vector<8x1xf32>
    %184 = vector.broadcast %183 : vector<8x1xf32> to vector<8x32xf32>
    %185 = arith.mulf %184, %6 : vector<8x32xf32>
    %186 = vector.extract_strided_slice %179 {offsets = [0, 2], sizes = [8, 1], strides = [1, 1]} : vector<8x8xf32> to vector<8x1xf32>
    %187 = vector.broadcast %186 : vector<8x1xf32> to vector<8x32xf32>
    %188 = arith.mulf %187, %9 : vector<8x32xf32>
    %189 = vector.extract_strided_slice %179 {offsets = [0, 3], sizes = [8, 1], strides = [1, 1]} : vector<8x8xf32> to vector<8x1xf32>
    %190 = vector.broadcast %189 : vector<8x1xf32> to vector<8x32xf32>
    %191 = arith.mulf %190, %12 : vector<8x32xf32>
    %192 = vector.extract_strided_slice %179 {offsets = [0, 4], sizes = [8, 1], strides = [1, 1]} : vector<8x8xf32> to vector<8x1xf32>
    %193 = vector.broadcast %192 : vector<8x1xf32> to vector<8x32xf32>
    %194 = arith.mulf %193, %15 : vector<8x32xf32>
    %195 = vector.extract_strided_slice %179 {offsets = [0, 5], sizes = [8, 1], strides = [1, 1]} : vector<8x8xf32> to vector<8x1xf32>
    %196 = vector.broadcast %195 : vector<8x1xf32> to vector<8x32xf32>
    %197 = arith.mulf %196, %18 : vector<8x32xf32>
    %198 = vector.extract_strided_slice %179 {offsets = [0, 6], sizes = [8, 1], strides = [1, 1]} : vector<8x8xf32> to vector<8x1xf32>
    %199 = vector.broadcast %198 : vector<8x1xf32> to vector<8x32xf32>
    %200 = arith.mulf %199, %21 : vector<8x32xf32>
    %201 = vector.extract_strided_slice %179 {offsets = [0, 7], sizes = [8, 1], strides = [1, 1]} : vector<8x8xf32> to vector<8x1xf32>
    %202 = vector.broadcast %201 : vector<8x1xf32> to vector<8x32xf32>
    %203 = arith.mulf %202, %24 : vector<8x32xf32>
    %204 = arith.addf %182, %185 : vector<8x32xf32>
    %205 = arith.addf %188, %191 : vector<8x32xf32>
    %206 = arith.addf %194, %197 : vector<8x32xf32>
    %207 = arith.addf %200, %203 : vector<8x32xf32>
    %208 = arith.addf %204, %205 : vector<8x32xf32>
    %209 = arith.addf %206, %207 : vector<8x32xf32>
    %210 = arith.addf %208, %209 : vector<8x32xf32>
    %211 = vector.extract_strided_slice %30 {offsets = [0, 96], sizes = [8, 32], strides = [1, 1]} : vector<8x256xf32> to vector<8x32xf32>
    %212 = arith.addf %211, %210 : vector<8x32xf32>
    %213 = vector.extract_strided_slice %212 {offsets = [0, 0], sizes = [8, 24], strides = [1, 1]} : vector<8x32xf32> to vector<8x24xf32>
    %214 = arith.negf %213 : vector<8x24xf32>
    %215 = math.exp %214 : vector<8x24xf32>
    %cst_12 = arith.constant 1.000000e+00 : f32
    %216 = vector.broadcast %cst_12 : f32 to vector<8x24xf32>
    %217 = arith.addf %216, %215 : vector<8x24xf32>
    %218 = arith.divf %216, %217 : vector<8x24xf32>
    %219 = vector.extract_strided_slice %218 {offsets = [0, 0], sizes = [8, 8], strides = [1, 1]} : vector<8x24xf32> to vector<8x8xf32>
    %220 = vector.extract_strided_slice %218 {offsets = [0, 8], sizes = [8, 8], strides = [1, 1]} : vector<8x24xf32> to vector<8x8xf32>
    %221 = vector.extract_strided_slice %218 {offsets = [0, 16], sizes = [8, 8], strides = [1, 1]} : vector<8x24xf32> to vector<8x8xf32>
    %222 = vector.extract_strided_slice %212 {offsets = [0, 24], sizes = [8, 8], strides = [1, 1]} : vector<8x32xf32> to vector<8x8xf32>
    %223 = math.tanh %222 : vector<8x8xf32>
    %224 = arith.mulf %220, %177 : vector<8x8xf32>
    %225 = arith.mulf %219, %223 : vector<8x8xf32>
    %226 = arith.addf %224, %225 : vector<8x8xf32>
    %227 = math.tanh %226 : vector<8x8xf32>
    %228 = arith.mulf %221, %227 : vector<8x8xf32>
    %229 = vector.extract_strided_slice %228 {offsets = [0, 0], sizes = [8, 1], strides = [1, 1]} : vector<8x8xf32> to vector<8x1xf32>
    %230 = vector.broadcast %229 : vector<8x1xf32> to vector<8x32xf32>
    %231 = arith.mulf %230, %3 : vector<8x32xf32>
    %232 = vector.extract_strided_slice %228 {offsets = [0, 1], sizes = [8, 1], strides = [1, 1]} : vector<8x8xf32> to vector<8x1xf32>
    %233 = vector.broadcast %232 : vector<8x1xf32> to vector<8x32xf32>
    %234 = arith.mulf %233, %6 : vector<8x32xf32>
    %235 = vector.extract_strided_slice %228 {offsets = [0, 2], sizes = [8, 1], strides = [1, 1]} : vector<8x8xf32> to vector<8x1xf32>
    %236 = vector.broadcast %235 : vector<8x1xf32> to vector<8x32xf32>
    %237 = arith.mulf %236, %9 : vector<8x32xf32>
    %238 = vector.extract_strided_slice %228 {offsets = [0, 3], sizes = [8, 1], strides = [1, 1]} : vector<8x8xf32> to vector<8x1xf32>
    %239 = vector.broadcast %238 : vector<8x1xf32> to vector<8x32xf32>
    %240 = arith.mulf %239, %12 : vector<8x32xf32>
    %241 = vector.extract_strided_slice %228 {offsets = [0, 4], sizes = [8, 1], strides = [1, 1]} : vector<8x8xf32> to vector<8x1xf32>
    %242 = vector.broadcast %241 : vector<8x1xf32> to vector<8x32xf32>
    %243 = arith.mulf %242, %15 : vector<8x32xf32>
    %244 = vector.extract_strided_slice %228 {offsets = [0, 5], sizes = [8, 1], strides = [1, 1]} : vector<8x8xf32> to vector<8x1xf32>
    %245 = vector.broadcast %244 : vector<8x1xf32> to vector<8x32xf32>
    %246 = arith.mulf %245, %18 : vector<8x32xf32>
    %247 = vector.extract_strided_slice %228 {offsets = [0, 6], sizes = [8, 1], strides = [1, 1]} : vector<8x8xf32> to vector<8x1xf32>
    %248 = vector.broadcast %247 : vector<8x1xf32> to vector<8x32xf32>
    %249 = arith.mulf %248, %21 : vector<8x32xf32>
    %250 = vector.extract_strided_slice %228 {offsets = [0, 7], sizes = [8, 1], strides = [1, 1]} : vector<8x8xf32> to vector<8x1xf32>
    %251 = vector.broadcast %250 : vector<8x1xf32> to vector<8x32xf32>
    %252 = arith.mulf %251, %24 : vector<8x32xf32>
    %253 = arith.addf %231, %234 : vector<8x32xf32>
    %254 = arith.addf %237, %240 : vector<8x32xf32>
    %255 = arith.addf %243, %246 : vector<8x32xf32>
    %256 = arith.addf %249, %252 : vector<8x32xf32>
    %257 = arith.addf %253, %254 : vector<8x32xf32>
    %258 = arith.addf %255, %256 : vector<8x32xf32>
    %259 = arith.addf %257, %258 : vector<8x32xf32>
    %260 = vector.extract_strided_slice %30 {offsets = [0, 128], sizes = [8, 32], strides = [1, 1]} : vector<8x256xf32> to vector<8x32xf32>
    %261 = arith.addf %260, %259 : vector<8x32xf32>
    %262 = vector.extract_strided_slice %261 {offsets = [0, 0], sizes = [8, 24], strides = [1, 1]} : vector<8x32xf32> to vector<8x24xf32>
    %263 = arith.negf %262 : vector<8x24xf32>
    %264 = math.exp %263 : vector<8x24xf32>
    %cst_13 = arith.constant 1.000000e+00 : f32
    %265 = vector.broadcast %cst_13 : f32 to vector<8x24xf32>
    %266 = arith.addf %265, %264 : vector<8x24xf32>
    %267 = arith.divf %265, %266 : vector<8x24xf32>
    %268 = vector.extract_strided_slice %267 {offsets = [0, 0], sizes = [8, 8], strides = [1, 1]} : vector<8x24xf32> to vector<8x8xf32>
    %269 = vector.extract_strided_slice %267 {offsets = [0, 8], sizes = [8, 8], strides = [1, 1]} : vector<8x24xf32> to vector<8x8xf32>
    %270 = vector.extract_strided_slice %267 {offsets = [0, 16], sizes = [8, 8], strides = [1, 1]} : vector<8x24xf32> to vector<8x8xf32>
    %271 = vector.extract_strided_slice %261 {offsets = [0, 24], sizes = [8, 8], strides = [1, 1]} : vector<8x32xf32> to vector<8x8xf32>
    %272 = math.tanh %271 : vector<8x8xf32>
    %273 = arith.mulf %269, %226 : vector<8x8xf32>
    %274 = arith.mulf %268, %272 : vector<8x8xf32>
    %275 = arith.addf %273, %274 : vector<8x8xf32>
    %276 = math.tanh %275 : vector<8x8xf32>
    %277 = arith.mulf %270, %276 : vector<8x8xf32>
    %278 = vector.extract_strided_slice %277 {offsets = [0, 0], sizes = [8, 1], strides = [1, 1]} : vector<8x8xf32> to vector<8x1xf32>
    %279 = vector.broadcast %278 : vector<8x1xf32> to vector<8x32xf32>
    %280 = arith.mulf %279, %3 : vector<8x32xf32>
    %281 = vector.extract_strided_slice %277 {offsets = [0, 1], sizes = [8, 1], strides = [1, 1]} : vector<8x8xf32> to vector<8x1xf32>
    %282 = vector.broadcast %281 : vector<8x1xf32> to vector<8x32xf32>
    %283 = arith.mulf %282, %6 : vector<8x32xf32>
    %284 = vector.extract_strided_slice %277 {offsets = [0, 2], sizes = [8, 1], strides = [1, 1]} : vector<8x8xf32> to vector<8x1xf32>
    %285 = vector.broadcast %284 : vector<8x1xf32> to vector<8x32xf32>
    %286 = arith.mulf %285, %9 : vector<8x32xf32>
    %287 = vector.extract_strided_slice %277 {offsets = [0, 3], sizes = [8, 1], strides = [1, 1]} : vector<8x8xf32> to vector<8x1xf32>
    %288 = vector.broadcast %287 : vector<8x1xf32> to vector<8x32xf32>
    %289 = arith.mulf %288, %12 : vector<8x32xf32>
    %290 = vector.extract_strided_slice %277 {offsets = [0, 4], sizes = [8, 1], strides = [1, 1]} : vector<8x8xf32> to vector<8x1xf32>
    %291 = vector.broadcast %290 : vector<8x1xf32> to vector<8x32xf32>
    %292 = arith.mulf %291, %15 : vector<8x32xf32>
    %293 = vector.extract_strided_slice %277 {offsets = [0, 5], sizes = [8, 1], strides = [1, 1]} : vector<8x8xf32> to vector<8x1xf32>
    %294 = vector.broadcast %293 : vector<8x1xf32> to vector<8x32xf32>
    %295 = arith.mulf %294, %18 : vector<8x32xf32>
    %296 = vector.extract_strided_slice %277 {offsets = [0, 6], sizes = [8, 1], strides = [1, 1]} : vector<8x8xf32> to vector<8x1xf32>
    %297 = vector.broadcast %296 : vector<8x1xf32> to vector<8x32xf32>
    %298 = arith.mulf %297, %21 : vector<8x32xf32>
    %299 = vector.extract_strided_slice %277 {offsets = [0, 7], sizes = [8, 1], strides = [1, 1]} : vector<8x8xf32> to vector<8x1xf32>
    %300 = vector.broadcast %299 : vector<8x1xf32> to vector<8x32xf32>
    %301 = arith.mulf %300, %24 : vector<8x32xf32>
    %302 = arith.addf %280, %283 : vector<8x32xf32>
    %303 = arith.addf %286, %289 : vector<8x32xf32>
    %304 = arith.addf %292, %295 : vector<8x32xf32>
    %305 = arith.addf %298, %301 : vector<8x32xf32>
    %306 = arith.addf %302, %303 : vector<8x32xf32>
    %307 = arith.addf %304, %305 : vector<8x32xf32>
    %308 = arith.addf %306, %307 : vector<8x32xf32>
    %309 = vector.extract_strided_slice %30 {offsets = [0, 160], sizes = [8, 32], strides = [1, 1]} : vector<8x256xf32> to vector<8x32xf32>
    %310 = arith.addf %309, %308 : vector<8x32xf32>
    %311 = vector.extract_strided_slice %310 {offsets = [0, 0], sizes = [8, 24], strides = [1, 1]} : vector<8x32xf32> to vector<8x24xf32>
    %312 = arith.negf %311 : vector<8x24xf32>
    %313 = math.exp %312 : vector<8x24xf32>
    %cst_14 = arith.constant 1.000000e+00 : f32
    %314 = vector.broadcast %cst_14 : f32 to vector<8x24xf32>
    %315 = arith.addf %314, %313 : vector<8x24xf32>
    %316 = arith.divf %314, %315 : vector<8x24xf32>
    %317 = vector.extract_strided_slice %316 {offsets = [0, 0], sizes = [8, 8], strides = [1, 1]} : vector<8x24xf32> to vector<8x8xf32>
    %318 = vector.extract_strided_slice %316 {offsets = [0, 8], sizes = [8, 8], strides = [1, 1]} : vector<8x24xf32> to vector<8x8xf32>
    %319 = vector.extract_strided_slice %316 {offsets = [0, 16], sizes = [8, 8], strides = [1, 1]} : vector<8x24xf32> to vector<8x8xf32>
    %320 = vector.extract_strided_slice %310 {offsets = [0, 24], sizes = [8, 8], strides = [1, 1]} : vector<8x32xf32> to vector<8x8xf32>
    %321 = math.tanh %320 : vector<8x8xf32>
    %322 = arith.mulf %318, %275 : vector<8x8xf32>
    %323 = arith.mulf %317, %321 : vector<8x8xf32>
    %324 = arith.addf %322, %323 : vector<8x8xf32>
    %325 = math.tanh %324 : vector<8x8xf32>
    %326 = arith.mulf %319, %325 : vector<8x8xf32>
    %327 = vector.extract_strided_slice %326 {offsets = [0, 0], sizes = [8, 1], strides = [1, 1]} : vector<8x8xf32> to vector<8x1xf32>
    %328 = vector.broadcast %327 : vector<8x1xf32> to vector<8x32xf32>
    %329 = arith.mulf %328, %3 : vector<8x32xf32>
    %330 = vector.extract_strided_slice %326 {offsets = [0, 1], sizes = [8, 1], strides = [1, 1]} : vector<8x8xf32> to vector<8x1xf32>
    %331 = vector.broadcast %330 : vector<8x1xf32> to vector<8x32xf32>
    %332 = arith.mulf %331, %6 : vector<8x32xf32>
    %333 = vector.extract_strided_slice %326 {offsets = [0, 2], sizes = [8, 1], strides = [1, 1]} : vector<8x8xf32> to vector<8x1xf32>
    %334 = vector.broadcast %333 : vector<8x1xf32> to vector<8x32xf32>
    %335 = arith.mulf %334, %9 : vector<8x32xf32>
    %336 = vector.extract_strided_slice %326 {offsets = [0, 3], sizes = [8, 1], strides = [1, 1]} : vector<8x8xf32> to vector<8x1xf32>
    %337 = vector.broadcast %336 : vector<8x1xf32> to vector<8x32xf32>
    %338 = arith.mulf %337, %12 : vector<8x32xf32>
    %339 = vector.extract_strided_slice %326 {offsets = [0, 4], sizes = [8, 1], strides = [1, 1]} : vector<8x8xf32> to vector<8x1xf32>
    %340 = vector.broadcast %339 : vector<8x1xf32> to vector<8x32xf32>
    %341 = arith.mulf %340, %15 : vector<8x32xf32>
    %342 = vector.extract_strided_slice %326 {offsets = [0, 5], sizes = [8, 1], strides = [1, 1]} : vector<8x8xf32> to vector<8x1xf32>
    %343 = vector.broadcast %342 : vector<8x1xf32> to vector<8x32xf32>
    %344 = arith.mulf %343, %18 : vector<8x32xf32>
    %345 = vector.extract_strided_slice %326 {offsets = [0, 6], sizes = [8, 1], strides = [1, 1]} : vector<8x8xf32> to vector<8x1xf32>
    %346 = vector.broadcast %345 : vector<8x1xf32> to vector<8x32xf32>
    %347 = arith.mulf %346, %21 : vector<8x32xf32>
    %348 = vector.extract_strided_slice %326 {offsets = [0, 7], sizes = [8, 1], strides = [1, 1]} : vector<8x8xf32> to vector<8x1xf32>
    %349 = vector.broadcast %348 : vector<8x1xf32> to vector<8x32xf32>
    %350 = arith.mulf %349, %24 : vector<8x32xf32>
    %351 = arith.addf %329, %332 : vector<8x32xf32>
    %352 = arith.addf %335, %338 : vector<8x32xf32>
    %353 = arith.addf %341, %344 : vector<8x32xf32>
    %354 = arith.addf %347, %350 : vector<8x32xf32>
    %355 = arith.addf %351, %352 : vector<8x32xf32>
    %356 = arith.addf %353, %354 : vector<8x32xf32>
    %357 = arith.addf %355, %356 : vector<8x32xf32>
    %358 = vector.extract_strided_slice %30 {offsets = [0, 192], sizes = [8, 32], strides = [1, 1]} : vector<8x256xf32> to vector<8x32xf32>
    %359 = arith.addf %358, %357 : vector<8x32xf32>
    %360 = vector.extract_strided_slice %359 {offsets = [0, 0], sizes = [8, 24], strides = [1, 1]} : vector<8x32xf32> to vector<8x24xf32>
    %361 = arith.negf %360 : vector<8x24xf32>
    %362 = math.exp %361 : vector<8x24xf32>
    %cst_15 = arith.constant 1.000000e+00 : f32
    %363 = vector.broadcast %cst_15 : f32 to vector<8x24xf32>
    %364 = arith.addf %363, %362 : vector<8x24xf32>
    %365 = arith.divf %363, %364 : vector<8x24xf32>
    %366 = vector.extract_strided_slice %365 {offsets = [0, 0], sizes = [8, 8], strides = [1, 1]} : vector<8x24xf32> to vector<8x8xf32>
    %367 = vector.extract_strided_slice %365 {offsets = [0, 8], sizes = [8, 8], strides = [1, 1]} : vector<8x24xf32> to vector<8x8xf32>
    %368 = vector.extract_strided_slice %365 {offsets = [0, 16], sizes = [8, 8], strides = [1, 1]} : vector<8x24xf32> to vector<8x8xf32>
    %369 = vector.extract_strided_slice %359 {offsets = [0, 24], sizes = [8, 8], strides = [1, 1]} : vector<8x32xf32> to vector<8x8xf32>
    %370 = math.tanh %369 : vector<8x8xf32>
    %371 = arith.mulf %367, %324 : vector<8x8xf32>
    %372 = arith.mulf %366, %370 : vector<8x8xf32>
    %373 = arith.addf %371, %372 : vector<8x8xf32>
    %374 = math.tanh %373 : vector<8x8xf32>
    %375 = arith.mulf %368, %374 : vector<8x8xf32>
    %376 = vector.extract_strided_slice %375 {offsets = [0, 0], sizes = [8, 1], strides = [1, 1]} : vector<8x8xf32> to vector<8x1xf32>
    %377 = vector.broadcast %376 : vector<8x1xf32> to vector<8x32xf32>
    %378 = arith.mulf %377, %3 : vector<8x32xf32>
    %379 = vector.extract_strided_slice %375 {offsets = [0, 1], sizes = [8, 1], strides = [1, 1]} : vector<8x8xf32> to vector<8x1xf32>
    %380 = vector.broadcast %379 : vector<8x1xf32> to vector<8x32xf32>
    %381 = arith.mulf %380, %6 : vector<8x32xf32>
    %382 = vector.extract_strided_slice %375 {offsets = [0, 2], sizes = [8, 1], strides = [1, 1]} : vector<8x8xf32> to vector<8x1xf32>
    %383 = vector.broadcast %382 : vector<8x1xf32> to vector<8x32xf32>
    %384 = arith.mulf %383, %9 : vector<8x32xf32>
    %385 = vector.extract_strided_slice %375 {offsets = [0, 3], sizes = [8, 1], strides = [1, 1]} : vector<8x8xf32> to vector<8x1xf32>
    %386 = vector.broadcast %385 : vector<8x1xf32> to vector<8x32xf32>
    %387 = arith.mulf %386, %12 : vector<8x32xf32>
    %388 = vector.extract_strided_slice %375 {offsets = [0, 4], sizes = [8, 1], strides = [1, 1]} : vector<8x8xf32> to vector<8x1xf32>
    %389 = vector.broadcast %388 : vector<8x1xf32> to vector<8x32xf32>
    %390 = arith.mulf %389, %15 : vector<8x32xf32>
    %391 = vector.extract_strided_slice %375 {offsets = [0, 5], sizes = [8, 1], strides = [1, 1]} : vector<8x8xf32> to vector<8x1xf32>
    %392 = vector.broadcast %391 : vector<8x1xf32> to vector<8x32xf32>
    %393 = arith.mulf %392, %18 : vector<8x32xf32>
    %394 = vector.extract_strided_slice %375 {offsets = [0, 6], sizes = [8, 1], strides = [1, 1]} : vector<8x8xf32> to vector<8x1xf32>
    %395 = vector.broadcast %394 : vector<8x1xf32> to vector<8x32xf32>
    %396 = arith.mulf %395, %21 : vector<8x32xf32>
    %397 = vector.extract_strided_slice %375 {offsets = [0, 7], sizes = [8, 1], strides = [1, 1]} : vector<8x8xf32> to vector<8x1xf32>
    %398 = vector.broadcast %397 : vector<8x1xf32> to vector<8x32xf32>
    %399 = arith.mulf %398, %24 : vector<8x32xf32>
    %400 = arith.addf %378, %381 : vector<8x32xf32>
    %401 = arith.addf %384, %387 : vector<8x32xf32>
    %402 = arith.addf %390, %393 : vector<8x32xf32>
    %403 = arith.addf %396, %399 : vector<8x32xf32>
    %404 = arith.addf %400, %401 : vector<8x32xf32>
    %405 = arith.addf %402, %403 : vector<8x32xf32>
    %406 = arith.addf %404, %405 : vector<8x32xf32>
    %407 = vector.extract_strided_slice %30 {offsets = [0, 224], sizes = [8, 32], strides = [1, 1]} : vector<8x256xf32> to vector<8x32xf32>
    %408 = arith.addf %407, %406 : vector<8x32xf32>
    %409 = vector.extract_strided_slice %408 {offsets = [0, 0], sizes = [8, 24], strides = [1, 1]} : vector<8x32xf32> to vector<8x24xf32>
    %410 = arith.negf %409 : vector<8x24xf32>
    %411 = math.exp %410 : vector<8x24xf32>
    %cst_16 = arith.constant 1.000000e+00 : f32
    %412 = vector.broadcast %cst_16 : f32 to vector<8x24xf32>
    %413 = arith.addf %412, %411 : vector<8x24xf32>
    %414 = arith.divf %412, %413 : vector<8x24xf32>
    %415 = vector.extract_strided_slice %414 {offsets = [0, 0], sizes = [8, 8], strides = [1, 1]} : vector<8x24xf32> to vector<8x8xf32>
    %416 = vector.extract_strided_slice %414 {offsets = [0, 8], sizes = [8, 8], strides = [1, 1]} : vector<8x24xf32> to vector<8x8xf32>
    %417 = vector.extract_strided_slice %414 {offsets = [0, 16], sizes = [8, 8], strides = [1, 1]} : vector<8x24xf32> to vector<8x8xf32>
    %418 = vector.extract_strided_slice %408 {offsets = [0, 24], sizes = [8, 8], strides = [1, 1]} : vector<8x32xf32> to vector<8x8xf32>
    %419 = math.tanh %418 : vector<8x8xf32>
    %420 = arith.mulf %416, %373 : vector<8x8xf32>
    %421 = arith.mulf %415, %419 : vector<8x8xf32>
    %422 = arith.addf %420, %421 : vector<8x8xf32>
    %423 = math.tanh %422 : vector<8x8xf32>
    %424 = arith.mulf %417, %423 : vector<8x8xf32>
    %425 = tpu.concatenate %81, %130, %179, %228, %277, %326, %375, %424 in 1 : vector<8x8xf32>, vector<8x8xf32>, vector<8x8xf32>, vector<8x8xf32>, vector<8x8xf32>, vector<8x8xf32>, vector<8x8xf32>, vector<8x8xf32> -> vector<8x64xf32>
    %c0_17 = arith.constant 0 : index
    %c0_18 = arith.constant 0 : index
    %426 = vector.load %arg5[%c0_17, %c0_18] : memref<8x72xf32, #tpu.memory_space<vmem>>, vector<8x64xf32>
    tpu.vector_store %arg5[%c0_17, %c0_18], %425 {strides = array<i32>} : memref<8x72xf32, #tpu.memory_space<vmem>>, vector<8x64xf32>,
    %c0_19 = arith.constant 0 : index
    %c64 = arith.constant 64 : index
    %427 = vector.load %arg5[%c0_19, %c64] : memref<8x72xf32, #tpu.memory_space<vmem>>, vector<8x8xf32>
    tpu.vector_store %arg5[%c0_19, %c64], %422 {strides = array<i32>} : memref<8x72xf32, #tpu.memory_space<vmem>>, vector<8x8xf32>,
    return
  }
  func.func @transform_0(%arg0: i32) -> (i32, i32) {
    %c0_i32 = arith.constant 0 : i32
    %c0_i32_0 = arith.constant 0 : i32
    return %arg0, %c0_i32 : i32, i32
  }
  func.func @transform_1(%arg0: i32) -> (i32, i32) {
    %c0_i32 = arith.constant 0 : i32
    %c0_i32_0 = arith.constant 0 : i32
    %c0_i32_1 = arith.constant 0 : i32
    return %c0_i32, %c0_i32_0 : i32, i32
  }
  func.func @transform_2(%arg0: i32) -> (i32, i32) {
    %c0_i32 = arith.constant 0 : i32
    %c0_i32_0 = arith.constant 0 : i32
    %c0_i32_1 = arith.constant 0 : i32
    return %c0_i32, %c0_i32_0 : i32, i32
  }
  func.func @transform_3(%arg0: i32) -> (i32, i32) {
    %c0_i32 = arith.constant 0 : i32
    %c0_i32_0 = arith.constant 0 : i32
    %c0_i32_1 = arith.constant 0 : i32
    return %c0_i32, %c0_i32_0 : i32, i32
  }
  func.func @transform_4(%arg0: i32) -> (i32, i32) {
    %c0_i32 = arith.constant 0 : i32
    %c0_i32_0 = arith.constant 0 : i32
    return %arg0, %c0_i32 : i32, i32
  }
}

</mosaic_0001>

<bundles_post_ra>
// kernel: tpu_custom_call.1
= control target key start
LH: loop header
LB: loop body
LE: loop exit
PB: predicated region body
PF: predicated region fallthrough
CT: control target
= control target key end

     0   :  { %9 = vsyncpa [#allocation3], 0  ;;  %s2055_s0 = inlined_call_operand.hbm [shape: f32[16,32], index: 0, kind: input, shape index: {}]   ;;  %s2056_s1 = inlined_call_operand.hbm [shape: f32[32,256], index: 1, kind: input, shape index: {}]   ;;  %s2057_s2 = inlined_call_operand.hbm [shape: f32[8,32], index: 2, kind: input, shape index: {}]   ;;  %s2058_s3 = inlined_call_operand.vmem [shape: f32[1,256], index: 3, kind: input, shape index: {}]   ;;  %s2059_s4 = inlined_call_operand.hbm [shape: f32[16,72], index: 4, kind: output, shape index: {}]  }
   0x1   :  { %11 = vsyncpa [#allocation3 + $0x1], 0 }
   0x2   :  { %12 = vsyncpa [#allocation6], 0 }
   0x3   :  { %13 = vsyncpa [#allocation4], 0 }
   0x4   :  { %15 = vsyncpa [#allocation4 + $0x1], 0  ;;  %s1605_s15 = smov 0   ;;  %s1607_s16 = smov 0  }
   0x5   :  { %s1609_s17 = smov 0   ;;  %s1611_s18 = smov 0  }
   0x6 LB: > { %s1626_s19 = sadd.s32 4294967295, %s1528_s18   ;;  %s1121_s20 = sadd.s32 4294967294, %s1528_s18   ;;  %s1528_s18 = sphi %s1611_s18, %s2081_s18   ;;  %s1524_s17 = sphi %s1609_s17, %s2080_s17   ;;  %s1520_s16 = sphi %s1607_s16, %s2079_s16   ;;  %s1516_s15 = sphi %s1605_s15, %s2078_s15  }
   0x7   : > { %p41_p0 = scmp.ne.s32.totalorder %s1520_s16, %s1516_s15  ;;  %p2060_p1 = scmp.eq.s32.totalorder %s1626_s19, 0 }
   0x8   : > { %p134_p3 = scmp.eq.s32.totalorder %s1121_s20, 1  ;;  %p1122_p5 = scmp.ge.s32.totalorder %s1528_s18, 1 }
   0x9   : > { %p1635_p4 = por %p2060_p1, %p41_p0  ;;  %p141_p7 = scmp.lt.s32.totalorder %s1528_s18, 3 }
   0xa   : > { %p1640_p6 = por %p134_p3, %p41_p0  ;;  %s1530_s24 = smov [#allocation5]  }
   0xb   : > { %s2064_s21 = scalar_select %p1635_p4, 1, 0 }
   0xc   : > { %s2065_s22 = scalar_select %p1640_p6, 1, 0 }
   0xd   : > { %p1645_p8 = pnand %p1122_p5, %p141_p7  ;;  %s153_s25 = sshll.u32 %s1530_s24, 4  ;;  %s154_s25 = int_to_ptr.vmem [resolvable:$true] %s153_s25 }
   0xe   : > { %s1531_s27 = smov [#allocation7]   ;;  %s1391_s29 = scalar_lea.vmem %s154_s25, 1024 }
   0xf   : > { %s2066_s23 = scalar_select %p1645_p8, 1, 0 }
  0x10   : > { %p1158_p9 = pneg %p1645_p8  ;;  %s167_s28 = sshll.u32 %s1531_s27, 4  ;;  %s168_s28 = int_to_ptr.vmem [resolvable:$true] %s167_s28 }
  0x11   : > { %p1392_p13 = scmp.ne.s32.totalorder %s154_s25, %s1391_s29  ;;  %p1399_p5 = scmp.lt.s32.totalorder %s154_s25, %s154_s25 }
  0x12   : > { %p1654_p11 = pnand %p1158_p9, %p2060_p1  ;;  %p1400_p7 = scmp.lt.s32.totalorder %s1391_s29, %s1391_s29 }
  0x14   : > { %p1382_p12 = pneg %p1654_p11  ;;  %p1401_p10 = por %p1400_p7, %p1399_p5 }
  0x16   : > { %p1394_p0 = pnand %p1392_p13, %p1382_p12 }
  0x18   : > { %p1395_p3 = pneg %p1394_p0 }
  0x1a   : > { %p1402_p9 = pnand %p1401_p10, %p1395_p3 }
  0x1c   : > { %1405 = shalt.err (!%p1402_p9)
}
  0x1d   : > { %s1532_s30 = smov 256   ;;  %s1533_s5 = smov 16  }
  0x1e   : > { %1161 = dma.hbm_to_vmem [thread:$0]  (!%p1654_p11), %s2056_s1, 1024, %s154_s25, [#allocation6], %s1532_s30, %s1532_s30, %s1533_s5  }
  0x1f   : > { %s1417_s8 = scalar_lea.vmem %s168_s28, 128  ;;  %p1425_p2 = scmp.lt.s32.totalorder %s168_s28, %s168_s28 }
  0x20   : > { %p1418_p1 = scmp.ne.s32.totalorder %s168_s28, %s1417_s8  ;;  %p1426_p6 = scmp.lt.s32.totalorder %s1417_s8, %s1417_s8 }
  0x22   : > { %p1420_p13 = pnand %p1418_p1, %p1382_p12  ;;  %p1427_p5 = por %p1426_p6, %p1425_p2 }
  0x24   : > { %p1421_p0 = pneg %p1420_p13 }
  0x26   : > { %p1428_p10 = pnand %p1427_p5, %p1421_p0 }
  0x28   : > { %1431 = shalt.err (!%p1428_p10)
}
  0x29   : > { %1164 = dma.hbm_to_vmem [thread:$0]  (!%p1654_p11), %s2057_s2, 128, %s168_s28, [#allocation6]  }
  0x2a   : > { %s1677_s11 = sadd.s32 1, %s1528_s18   ;;  %s28_s12 = sadd.s32 1, %s1524_s17 }
  0x2b   : > { %s25_s13 = ssub.s32 %s1528_s18, %s1677_s11  ;;  %p35_p1 = scmp.ne.s32.totalorder %s1524_s17, %s1520_s16 }
  0x2c   : > { %p26_p2 = scmp.eq.s32.totalorder %s25_s13, 0  ;;  %p36_p6 = scmp.eq.s32.totalorder %s1528_s18, 0 }
  0x2d   : > { %p2068_p12 = scmp.eq.s32.totalorder %s1626_s19, 1  ;;  %p1175_p7 = scmp.lt.s32.totalorder %s1528_s18, 2 }
  0x2e   : > { %s1693_s20 = scalar_select %p26_p2, %s1524_s17, %s28_s12  }
  0x2f   : > { %p1687_p3 = por %p2068_p12, %p35_p1  ;;  %p37_p9 = por %p36_p6, %p35_p1 }
  0x30   : > { %s181_s24 = sand.u32 1, %s1524_s17   ;;  %s1127_s26 = sshll.u32 %s1528_s18, 7 }
  0x31   : > { %s2069_s14 = scalar_select %p1687_p3, 1, 0 }
  0x32   : > { %s1126_s25 = sshll.u32 %s181_s24, 3  ;;  %s1700_s29 = scalar_lea.hbm %s2055_s0, %s1127_s26 }
  0x33   : > { %s185_s30 = scalar_lea.vmem [#allocation2], %s1126_s25  ;;  %p1702_p11 = pnand %p1175_p7, %p37_p9 }
  0x34   : > { %s192_s5 = sshll.u32 %s185_s30, 4  ;;  %s182_s7 = scalar_lea.sflag [#allocation3], %s181_s24  ;;  %s193_s5 = int_to_ptr.vmem [resolvable:$true] %s192_s5 }
  0x35   : > { %s1432_s8 = scalar_lea.hbm %s1700_s29, 128  ;;  %p1434_p0 = pneg %p1702_p11 }
  0x36   : > { %p1433_p13 = scmp.ne.s32.totalorder %s1700_s29, %s1432_s8  ;;  %s1437_s12 = scalar_lea.hbm %s2055_s0, 256 }
  0x37   : > { %p1438_p1 = scmp.lt.s32.totalorder %s1700_s29, %s2055_s0  ;;  %p1439_p2 = scmp.lt.s32.totalorder %s1437_s12, %s1432_s8 }
  0x38   : > { %p1435_p5 = pnand %p1434_p0, %p1433_p13 }
  0x39   : > { %p1440_p6 = por %p1439_p2, %p1438_p1 }
  0x3a   : > { %p1436_p10 = pneg %p1435_p5 }
  0x3c   : > { %p1441_p12 = pnand %p1440_p6, %p1436_p10 }
  0x3e   : > { %1444 = shalt.err (!%p1441_p12)
}
  0x3f   : > { %s1445_s26 = scalar_lea.vmem %s193_s5, 128  ;;  %s1534_s24 = smov [#allocation2]  }
  0x40   : > { %p1446_p7 = scmp.ne.s32.totalorder %s193_s5, %s1445_s26  ;;  %s1450_s27 = sshll.u32 %s1534_s24, 4  ;;  %s1451_s27 = int_to_ptr.vmem [resolvable:$false] %s1450_s27 }
  0x41   : > { %s1452_s28 = scalar_lea.vmem %s1451_s27, 256  ;;  %p1453_p13 = scmp.lt.s32.totalorder %s193_s5, %s1451_s27 }
  0x42   : > { %p1448_p9 = pnand %p1446_p7, %p1434_p0  ;;  %p1454_p5 = scmp.lt.s32.totalorder %s1452_s28, %s1445_s26 }
  0x44   : > { %p1449_p3 = pneg %p1448_p9  ;;  %p1455_p4 = por %p1454_p5, %p1453_p13 }
  0x46   : > { %p1456_p8 = pnand %p1455_p4, %p1449_p3 }
  0x48   : > { %1459 = shalt.err (!%p1456_p8)
}
  0x49   : > { %1168 = dma.hbm_to_vmem [thread:$0]  (!%p1702_p11), %s1700_s29, 128, %s193_s5, %s182_s7  }
  0x4a   : > { %p2071_p10 = scmp.ne.s32.totalorder %s2066_s23, 0 }
  0x4b   : > { %s1723_s30 = sand.u32 (!%p2071_p10), 1, %s1520_s16   ;;  %p2072_p4 = scmp.ne.s32.totalorder (!%p2071_p10), %s2064_s21, 0 }
  0x4c   : > { %201 = sbr.rel (%p2071_p10) target bundleno = 5221 (0x1465), region = 36  ;;  %s1129_s8 = sshll.u32 (!%p2071_p10), %s1723_s30, 3 }
  0x4d   : > { %s204_s9 = scalar_lea.sflag (!%p2071_p10), [#allocation3], %s1723_s30  ;;  %s207_s10 = scalar_lea.vmem (!%p2071_p10), [#allocation2], %s1129_s8 }
  0x51   : > { %1503 = dma.done.wait (%p2072_p4), %s204_s9, 128  }
  0x52   : > { %1505 = vsyncadd (%p2072_p4), %s204_s9, 4294967168  ;;  %p2073_p8 = scmp.eq.s32.totalorder %s1626_s19, 0 }
  0x54   : > { %1507 = dma.done.wait (%p2073_p8), [#allocation6], 1152   ;;  %p2074_p3 = pmov %p2073_p8 }
  0x55   : > { %v1535_v0 = vmov 0.0   ;;  %v281_v1 = vld [vmem:[#allocation5 + $0x38] sm:$0xff]  ;;  %v280_v2 = vld [vmem:[#allocation5 + $0x30] sm:$0xff]  ;;  %v279_v3 = vld [vmem:[#allocation5 + $0x28] sm:$0xff]  ;;  %vm294_vm0 = vcmask 261120   ;;  %v241_v10 = vlaneseq  ;;  %s1536_s29 = smov 104  }
  0x56   : > { %1509 = vsyncadd (%p2074_p3), [#allocation6], 4294966144  ;;  %362 = vmatprep.mubr.f32.mxu0 %v1535_v0  ;;  %322 = vmatprep.subr.mxu0 %v281_v1  ;;  %v278_v4 = vld [vmem:[#allocation5 + $0x20] sm:$0xff]  ;;  %v277_v5 = vld [vmem:[#allocation5 + $0x18] sm:$0xff]  ;;  %s1537_s5 = smov 8   ;;  %v1538_v59 = vmov 17  }
  0x57   : > { %323 = vmatpush1.msra.mxu0 %v280_v2  ;;  %v276_v6 = vld [vmem:[#allocation5 + $0x10] sm:$0xff]  ;;  %v275_v7 = vld [vmem:[#allocation5 + $0x8] sm:$0xff]  ;;  %v274_v8 = vld [vmem:[#allocation5] sm:$0xff]  ;;  %v1738_v11 = vshrl.u32 %v241_v10, 7  ;;  %1260 = vset.pattern.permute.xlu0 %v1538_v59  ;;  %v1539_v60 = vmov 16   ;;  %v1540_v0 = vmov 20  }
  0x58   : > { %324 = vmatprep.subr.mxu0 %v279_v3  ;;  %v273_v9 = vld [vmem:[%s207_s10] sm:$0xff]  ;;  %v240_v16 = vld [vmem:[#allocation7] sm:$0xff]  ;;  %1259 = vset.pattern.permute.xlu1 %v1539_v60  ;;  %v1541_v1 = vmov 18   ;;  %v1542_v2 = vmov 23   ;;  %v1543_v3 = vmov 19   ;;  %s1544_s6 = smov 32  }
  0x59   : > { %325 = vmatpush1.msra.mxu0 %v278_v4  ;;  %v243_v12 = vsub.s32 0, %v1738_v11  ;;  %v251_v13 = vsub.s32 2, %v1738_v11  ;;  %v255_v14 = vsub.s32 3, %v1738_v11  ;;  %v247_v15 = vsub.s32 1, %v1738_v11  ;;  %v1777_v41 = vld [vmem:[%s2058_s3] sm:$0x3] }
  0x5a   : > { %326 = vmatprep.subr.mxu0 %v277_v5  ;;  %v259_v17 = vsub.s32 4, %v1738_v11  ;;  %v263_v18 = vsub.s32 5, %v1738_v11  ;;  %v267_v19 = vsub.s32 6, %v1738_v11  ;;  %v271_v20 = vsub.s32 7, %v1738_v11  ;;  %s1555_s7 = smov 64   ;;  %s1564_s12 = smov 96  }
  0x5b   : > { %327 = vmatpush1.msra.mxu0 %v276_v6  ;;  %v1748_v21 = vrot.slane %v240_v16, %v243_v12  ;;  %v1750_v22 = vrot.slane %v240_v16, %v251_v13  ;;  %v1752_v23 = vrot.slane %v240_v16, %v255_v14  ;;  %v1756_v24 = vrot.slane %v240_v16, %v247_v15  ;;  %s1573_s13 = smov 112   ;;  %s1574_s25 = smov 16  }
  0x5c   : > { %328 = vmatprep.subr.mxu0 %v275_v7  ;;  %v1758_v25 = vrot.slane %v240_v16, %v259_v17  ;;  %v1760_v26 = vrot.slane %v240_v16, %v263_v18  ;;  %v1762_v27 = vrot.slane %v240_v16, %v267_v19  ;;  %v1764_v28 = vrot.slane %v240_v16, %v271_v20  ;;  %s1575_s26 = smov 88   ;;  %s1576_s24 = smov 40  }
  0x5d   : > { %329 = vmatpush1.msra.mxu0 %v274_v8  ;;  %v369_v29 = vmul.f32 0.0, %v1748_v21  ;;  %v370_v30 = vmul.f32 0.0, %v1756_v24  ;;  %v371_v31 = vmul.f32 0.0, %v1750_v22  ;;  %v372_v32 = vmul.f32 0.0, %v1752_v23  ;;  %s1577_s27 = smov 120   ;;  %s1578_s28 = smov 72  }
  0x5e   : > { %1133 = vmatmul.mubr.msk.f32.vlgmr.msra.gmra.mxu0 %vm294_vm0, %v273_v9  ;;  %v373_v33 = vmul.f32 0.0, %v1758_v25  ;;  %v374_v34 = vmul.f32 0.0, %v1760_v26  ;;  %v375_v35 = vmul.f32 0.0, %v1762_v27  ;;  %v376_v36 = vmul.f32 0.0, %v1764_v28  ;;  %s1143_s9 = sshll.u32 %s1626_s19, 7  ;;  %s239_s10 = scalar_lea.vmem [#allocation8], %s1129_s8 }
  0x5f   : > { %v377_v37 = vadd.f32 %v370_v30, %v369_v29  ;;  %v378_v38 = vadd.f32 %v372_v32, %v371_v31  ;;  %v287_v44 = vrot.slane %v1777_v41, %v243_v12  ;;  %v1545_v4 = vmov 21   ;;  %s1032_s21 = sshll.u32 %s239_s10, 4  ;;  %s1019_s19 = scalar_lea.sflag [#allocation4], %s1723_s30  ;;  %s2014_s21 = int_to_ptr.vmem [resolvable:$true] %s1032_s21 }
  0x60   : > { %v379_v39 = vadd.f32 %v374_v34, %v373_v33  ;;  %v380_v40 = vadd.f32 %v376_v36, %v375_v35  ;;  %v1546_v5 = vmov 22   ;;  %vm997_vm1 = vcmask 64512   ;;  %s1460_s8 = scalar_lea.vmem %s2014_s21, 128  ;;  %p2075_p0 = scmp.ne.s32.totalorder %s2069_s14, 0 }
  0x61   : > { %v381_v42 = vadd.f32 %v378_v38, %v377_v37  ;;  %vm999_vm2 = vcmask 130048   ;;  %vm1001_vm3 = vcmask 195584   ;;  %vm1004_vm4 = vcmask 326656   ;;  %p1461_p11 = scmp.ne.s32.totalorder %s2014_s21, %s1460_s8 }
  0x62   : > { %v382_v43 = vadd.f32 %v380_v40, %v379_v39  ;;  %vm1006_vm5 = vcmask 392192   ;;  %vm1008_vm6 = vcmask 457728   ;;  %vm1010_vm7 = vcmask 523264  }
  0x63   : > { %vm1016_vm8 = vcmask 589312   ;;  %p1462_p1 = pnand %p1461_p11, %p2075_p0 }
  0x64   : > { %v383_v45 = vadd.f32 %v382_v43, %v381_v42 }
  0x65   : > { %p1463_p2 = pneg %p1462_p1 }
 0x11e   : > { %v364_v46 = vpop.f32.mrf.mxu0 }
 0x11f   : > { %v1780_v47 = vadd.f32 %v364_v46, %v287_v44 }
 0x121   : > { %v384_v48 = vadd.f32 %v383_v45, %v1780_v47 }
 0x123   : > { %1316 = vtanh.f32 %v384_v48  ;;  %v1134_v50 = vmul.f32 -1.442695, %v384_v48 }
 0x125   : > { %1318 = vpow2.f32 %v1134_v50 }
 0x130   : > { %v1317_v49 = vpop.eup %1316 }
 0x131   : > { %394 = vrot.lane.b32.xlu0 %v1317_v49, %s1536_s29 }
 0x132   : > { %v1319_v51 = vpop.eup %1318 }
 0x133   : > { %v388_v52 = vadd.f32 1.0, %v1319_v51 }
 0x135   : > { %1320 = vrcp.f32 %v388_v52 }
 0x142   : > { %v1321_v53 = vpop.eup %1320 }
 0x143   : > { %v392_v56 = vmul.f32 0.0, %v1321_v53 }
 0x1a3   : > { %v395_v54 = vpop.permute.xlu0 %394 }
 0x1a4   : > { %v397_v55 = vmul.f32 %v1321_v53, %v395_v54  ;;  %v1547_v54 = vmov 49  }
 0x1a6   : > { %399 = vrot.lane.b32.xlu0 %v397_v55, %s1537_s5  ;;  %v1548_v55 = vmov 48  }
 0x218   : > { %v400_v57 = vpop.permute.xlu0 %399 }
 0x219   : > { %v402_v58 = vadd.f32 %v400_v57, %v392_v56 }
 0x21b   : > { %1322 = vtanh.f32 %v402_v58 }
 0x228   : > { %v1323_v61 = vpop.eup %1322 }
 0x229   : > { %405 = vrot.lane.b32.xlu1 %v1323_v61, %s1537_s5  ;;  %v1549_v61 = vmov 52  }
 0x29b   : > { %v406_v62 = vpop.permute.xlu1 %405 }
 0x29c   : > { %v1788_v63 = vmul.f32 %v1321_v53, %v406_v62  ;;  %v1550_v62 = vmov 50  }
 0x29e   : > { %416 = vperm.xlu0 %1260, %v1788_v63   ;;  %411 = vperm.xlu1 %1259, %v1788_v63  }
 0x2a2   : > { %1263 = vset.pattern.permute.xlu0 %v1540_v0  ;;  %1261 = vset.pattern.permute.xlu1 %v1541_v1 }
 0x2a3   : > { %431 = vperm.xlu0 %1263, %v1788_v63   ;;  %421 = vperm.xlu1 %1261, %v1788_v63  }
 0x2a7   : > { %1266 = vset.pattern.permute.xlu0 %v1542_v2  ;;  %1262 = vset.pattern.permute.xlu1 %v1543_v3 }
 0x2a8   : > { %446 = vperm.xlu0 %1266, %v1788_v63   ;;  %426 = vperm.xlu1 %1262, %v1788_v63  }
 0x2ac   : > { %470 = vrot.lane.b32.xlu0 %v402_v58, %s1544_s6  ;;  %1264 = vset.pattern.permute.xlu1 %v1545_v4 }
 0x2ad   : > { %436 = vperm.xlu1 %1264, %v1788_v63   ;;  %1268 = vset.pattern.permute.xlu0 %v1547_v54 }
 0x2b1   : > { %1265 = vset.pattern.permute.xlu1 %v1546_v5 }
 0x2b2   : > { %441 = vperm.xlu1 %1265, %v1788_v63  }
 0x2b6   : > { %1267 = vset.pattern.permute.xlu1 %v1548_v55 }
 0x319   : > { %v412_v6 = vpop.permute.xlu1 %411  ;;  %v417_v8 = vpop.permute.xlu0 %416 }
 0x31a   : > { %v419_v16 = vmul.f32 %v417_v8, %v1756_v24  ;;  %v414_v17 = vmul.f32 %v412_v6, %v1748_v21  ;;  %v1551_v6 = vmov 55   ;;  %v1553_v8 = vmov 53  }
 0x31c   : > { %v450_v33 = vadd.f32 %v419_v16, %v414_v17 }
 0x31e   : > { %v422_v7 = vpop.permute.xlu1 %421  ;;  %v432_v10 = vpop.permute.xlu0 %431 }
 0x31f   : > { %v424_v18 = vmul.f32 %v422_v7, %v1750_v22  ;;  %v434_v29 = vmul.f32 %v432_v10, %v1758_v25  ;;  %v1552_v7 = vmov 51  }
 0x323   : > { %v427_v9 = vpop.permute.xlu1 %426  ;;  %v447_v14 = vpop.permute.xlu0 %446 }
 0x324   : > { %v429_v13 = vmul.f32 %v427_v9, %v1752_v23  ;;  %v449_v30 = vmul.f32 %v447_v14, %v1764_v28  ;;  %v1554_v9 = vmov 54  }
 0x326   : > { %v451_v31 = vadd.f32 %v429_v13, %v424_v18 }
 0x327   : > { %v471_v50 = vpop.permute.xlu0 %470 }
 0x328   : > { %v437_v12 = vpop.permute.xlu1 %436  ;;  %v454_v36 = vadd.f32 %v451_v31, %v450_v33 }
 0x329   : > { %v439_v19 = vmul.f32 %v437_v12, %v1760_v26 }
 0x32b   : > { %v452_v34 = vadd.f32 %v439_v19, %v434_v29 }
 0x32d   : > { %v442_v20 = vpop.permute.xlu1 %441 }
 0x32e   : > { %v444_v32 = vmul.f32 %v442_v20, %v1762_v27 }
 0x330   : > { %v453_v35 = vadd.f32 %v449_v30, %v444_v32 }
 0x332   : > { %v455_v37 = vadd.f32 %v453_v35, %v452_v34 }
 0x334   : > { %v456_v38 = vadd.f32 %v455_v37, %v454_v36 }
 0x336   : > { %458 = vrot.lane.b32.xlu1 %v456_v38, %s1544_s6 }
 0x3a8   : > { %v459_v39 = vpop.permute.xlu1 %458 }
 0x3a9   : > { %v461_v40 = vadd.f32 %v459_v39, %v1780_v47 }
 0x3ab   : > { %1324 = vtanh.f32 %v461_v40  ;;  %v1135_v43 = vmul.f32 -1.442695, %v461_v40 }
 0x3ad   : > { %1326 = vpow2.f32 %v1135_v43 }
 0x3b8   : > { %v1325_v42 = vpop.eup %1324 }
 0x3b9   : > { %475 = vrot.lane.b32.xlu1 %v1325_v42, %s1536_s29 }
 0x3ba   : > { %v1327_v44 = vpop.eup %1326 }
 0x3bb   : > { %v465_v45 = vadd.f32 1.0, %v1327_v44 }
 0x3bd   : > { %1328 = vrcp.f32 %v465_v45 }
 0x3ca   : > { %v1329_v46 = vpop.eup %1328 }
 0x3cb   : > { %v473_v51 = vmul.f32 %v1329_v46, %v471_v50 }
 0x42b   : > { %v476_v48 = vpop.permute.xlu1 %475 }
 0x42c   : > { %v478_v49 = vmul.f32 %v1329_v46, %v476_v48 }
 0x42e   : > { %480 = vrot.lane.b32.xlu1 %v478_v49, %s1537_s5 }
 0x4a0   : > { %v481_v52 = vpop.permute.xlu1 %480 }
 0x4a1   : > { %v483_v53 = vadd.f32 %v481_v52, %v473_v51 }
 0x4a3   : > { %1330 = vtanh.f32 %v483_v53 }
 0x4b0   : > { %v1331_v56 = vpop.eup %1330 }
 0x4b1   : > { %486 = vrot.lane.b32.xlu0 %v1331_v56, %s1537_s5 }
 0x523   : > { %v487_v57 = vpop.permute.xlu0 %486 }
 0x524   : > { %v1820_v58 = vmul.f32 %v1329_v46, %v487_v57 }
 0x526   : > { %497 = vperm.xlu0 %1268, %v1820_v58   ;;  %492 = vperm.xlu1 %1267, %v1820_v58  }
 0x52a   : > { %1271 = vset.pattern.permute.xlu0 %v1549_v61  ;;  %1269 = vset.pattern.permute.xlu1 %v1550_v62 }
 0x52b   : > { %512 = vperm.xlu0 %1271, %v1820_v58   ;;  %502 = vperm.xlu1 %1269, %v1820_v58  }
 0x52f   : > { %1274 = vset.pattern.permute.xlu0 %v1551_v6  ;;  %1270 = vset.pattern.permute.xlu1 %v1552_v7 }
 0x530   : > { %527 = vperm.xlu0 %1274, %v1820_v58   ;;  %507 = vperm.xlu1 %1270, %v1820_v58  }
 0x534   : > { %551 = vrot.lane.b32.xlu0 %v483_v53, %s1544_s6  ;;  %1272 = vset.pattern.permute.xlu1 %v1553_v8 }
 0x535   : > { %517 = vperm.xlu1 %1272, %v1820_v58  }
 0x539   : > { %1273 = vset.pattern.permute.xlu1 %v1554_v9 }
 0x53a   : > { %522 = vperm.xlu1 %1273, %v1820_v58  }
 0x5a1   : > { %v493_v10 = vpop.permute.xlu1 %492  ;;  %v498_v13 = vpop.permute.xlu0 %497 }
 0x5a2   : > { %v500_v20 = vmul.f32 %v498_v13, %v1756_v24  ;;  %v495_v29 = vmul.f32 %v493_v10, %v1748_v21  ;;  %v1556_v13 = vmov 81  }
 0x5a3   : > { %1276 = vset.pattern.permute.xlu0 %v1556_v13 }
 0x5a4   : > { %v531_v37 = vadd.f32 %v500_v20, %v495_v29  ;;  %v1559_v20 = vmov 82   ;;  %v1560_v29 = vmov 87  }
 0x5a6   : > { %v503_v12 = vpop.permute.xlu1 %502  ;;  %v513_v16 = vpop.permute.xlu0 %512 }
 0x5a7   : > { %v505_v30 = vmul.f32 %v503_v12, %v1750_v22  ;;  %v515_v33 = vmul.f32 %v513_v16, %v1758_v25 }
 0x5ab   : > { %v508_v14 = vpop.permute.xlu1 %507  ;;  %v528_v19 = vpop.permute.xlu0 %527 }
 0x5ac   : > { %v510_v18 = vmul.f32 %v508_v14, %v1752_v23  ;;  %v530_v34 = vmul.f32 %v528_v19, %v1764_v28  ;;  %v1557_v14 = vmov 80   ;;  %v1558_v19 = vmov 84  }
 0x5ad   : > { %1275 = vset.pattern.permute.xlu1 %v1557_v14 }
 0x5ae   : > { %v532_v35 = vadd.f32 %v510_v18, %v505_v30  ;;  %v1561_v30 = vmov 83  }
 0x5af   : > { %v552_v56 = vpop.permute.xlu0 %551 }
 0x5b0   : > { %v518_v17 = vpop.permute.xlu1 %517  ;;  %v535_v40 = vadd.f32 %v532_v35, %v531_v37 }
 0x5b1   : > { %v520_v31 = vmul.f32 %v518_v17, %v1760_v26 }
 0x5b3   : > { %v533_v38 = vadd.f32 %v520_v31, %v515_v33  ;;  %v1562_v31 = vmov 85  }
 0x5b5   : > { %v523_v32 = vpop.permute.xlu1 %522 }
 0x5b6   : > { %v525_v36 = vmul.f32 %v523_v32, %v1762_v27  ;;  %v1563_v32 = vmov 86  }
 0x5b8   : > { %v534_v39 = vadd.f32 %v530_v34, %v525_v36 }
 0x5ba   : > { %v536_v42 = vadd.f32 %v534_v39, %v533_v38 }
 0x5bc   : > { %v537_v43 = vadd.f32 %v536_v42, %v535_v40 }
 0x5be   : > { %539 = vrot.lane.b32.xlu1 %v537_v43, %s1555_s7 }
 0x630   : > { %v540_v44 = vpop.permute.xlu1 %539 }
 0x631   : > { %v542_v45 = vadd.f32 %v540_v44, %v1780_v47 }
 0x633   : > { %1332 = vtanh.f32 %v542_v45  ;;  %v1136_v48 = vmul.f32 -1.442695, %v542_v45 }
 0x635   : > { %1334 = vpow2.f32 %v1136_v48 }
 0x640   : > { %v1333_v46 = vpop.eup %1332 }
 0x641   : > { %556 = vrot.lane.b32.xlu1 %v1333_v46, %s1536_s29 }
 0x642   : > { %v1335_v49 = vpop.eup %1334 }
 0x643   : > { %v546_v50 = vadd.f32 1.0, %v1335_v49 }
 0x645   : > { %1336 = vrcp.f32 %v546_v50 }
 0x652   : > { %v1337_v51 = vpop.eup %1336 }
 0x653   : > { %v554_v57 = vmul.f32 %v1337_v51, %v552_v56 }
 0x6b3   : > { %v557_v52 = vpop.permute.xlu1 %556 }
 0x6b4   : > { %v559_v53 = vmul.f32 %v1337_v51, %v557_v52 }
 0x6b6   : > { %561 = vrot.lane.b32.xlu1 %v559_v53, %s1537_s5 }
 0x728   : > { %v562_v10 = vpop.permute.xlu1 %561 }
 0x729   : > { %v564_v12 = vadd.f32 %v562_v10, %v554_v57 }
 0x72b   : > { %1338 = vtanh.f32 %v564_v12 }
 0x738   : > { %v1339_v16 = vpop.eup %1338 }
 0x739   : > { %567 = vrot.lane.b32.xlu0 %v1339_v16, %s1537_s5 }
 0x7ab   : > { %v568_v17 = vpop.permute.xlu0 %567 }
 0x7ac   : > { %v1852_v18 = vmul.f32 %v1337_v51, %v568_v17 }
 0x7ae   : > { %578 = vperm.xlu0 %1276, %v1852_v18   ;;  %573 = vperm.xlu1 %1275, %v1852_v18  }
 0x7b2   : > { %1279 = vset.pattern.permute.xlu0 %v1558_v19  ;;  %1277 = vset.pattern.permute.xlu1 %v1559_v20 }
 0x7b3   : > { %593 = vperm.xlu0 %1279, %v1852_v18   ;;  %583 = vperm.xlu1 %1277, %v1852_v18  }
 0x7b7   : > { %1282 = vset.pattern.permute.xlu0 %v1560_v29  ;;  %1278 = vset.pattern.permute.xlu1 %v1561_v30 }
 0x7b8   : > { %608 = vperm.xlu0 %1282, %v1852_v18   ;;  %588 = vperm.xlu1 %1278, %v1852_v18  }
 0x7bc   : > { %632 = vrot.lane.b32.xlu0 %v564_v12, %s1544_s6  ;;  %1280 = vset.pattern.permute.xlu1 %v1562_v31 }
 0x7bd   : > { %598 = vperm.xlu1 %1280, %v1852_v18  }
 0x7c1   : > { %1281 = vset.pattern.permute.xlu1 %v1563_v32 }
 0x7c2   : > { %603 = vperm.xlu1 %1281, %v1852_v18  }
 0x829   : > { %v574_v33 = vpop.permute.xlu1 %573  ;;  %v579_v35 = vpop.permute.xlu0 %578 }
 0x82a   : > { %v581_v42 = vmul.f32 %v579_v35, %v1756_v24  ;;  %v576_v43 = vmul.f32 %v574_v33, %v1748_v21 }
 0x82c   : > { %v612_v52 = vadd.f32 %v581_v42, %v576_v43 }
 0x82e   : > { %v584_v34 = vpop.permute.xlu1 %583  ;;  %v594_v37 = vpop.permute.xlu0 %593 }
 0x82f   : > { %v586_v44 = vmul.f32 %v584_v34, %v1750_v22  ;;  %v596_v48 = vmul.f32 %v594_v37, %v1758_v25 }
 0x833   : > { %v589_v36 = vpop.permute.xlu1 %588  ;;  %v609_v40 = vpop.permute.xlu0 %608 }
 0x834   : > { %v591_v39 = vmul.f32 %v589_v36, %v1752_v23  ;;  %v611_v49 = vmul.f32 %v609_v40, %v1764_v28 }
 0x836   : > { %v613_v50 = vadd.f32 %v591_v39, %v586_v44 }
 0x837   : > { %v633_v40 = vpop.permute.xlu0 %632 }
 0x838   : > { %v599_v38 = vpop.permute.xlu1 %598  ;;  %v616_v57 = vadd.f32 %v613_v50, %v612_v52  ;;  %v1567_v50 = vmov 116   ;;  %v1569_v52 = vmov 119  }
 0x839   : > { %v601_v45 = vmul.f32 %v599_v38, %v1760_v26 }
 0x83b   : > { %v614_v53 = vadd.f32 %v601_v45, %v596_v48  ;;  %v1566_v45 = vmov 112  }
 0x83c   : > { %1283 = vset.pattern.permute.xlu1 %v1566_v45  ;;  %v291_v45 = vrot.slane %v1777_v41, %v247_v15 }
 0x83d   : > { %v604_v46 = vpop.permute.xlu1 %603 }
 0x83e   : > { %v606_v51 = vmul.f32 %v604_v46, %v1762_v27 }
 0x840   : > { %v615_v56 = vadd.f32 %v611_v49, %v606_v51  ;;  %v1568_v51 = vmov 114  }
 0x842   : > { %v617_v10 = vadd.f32 %v615_v56, %v614_v53  ;;  %v1570_v53 = vmov 115   ;;  %v1571_v56 = vmov 117  }
 0x844   : > { %v618_v12 = vadd.f32 %v617_v10, %v616_v57  ;;  %v1572_v57 = vmov 118  }
 0x846   : > { %620 = vrot.lane.b32.xlu1 %v618_v12, %s1564_s12 }
 0x8b8   : > { %v621_v16 = vpop.permute.xlu1 %620 }
 0x8b9   : > { %v623_v17 = vadd.f32 %v621_v16, %v1780_v47  ;;  %v1565_v47 = vmov 113  }
 0x8ba   : > { %1284 = vset.pattern.permute.xlu0 %v1565_v47 }
 0x8bb   : > { %1340 = vtanh.f32 %v623_v17  ;;  %v1137_v34 = vmul.f32 -1.442695, %v623_v17 }
 0x8bd   : > { %1342 = vpow2.f32 %v1137_v34 }
 0x8c8   : > { %v1341_v33 = vpop.eup %1340 }
 0x8c9   : > { %637 = vrot.lane.b32.xlu1 %v1341_v33, %s1536_s29 }
 0x8ca   : > { %v1343_v35 = vpop.eup %1342 }
 0x8cb   : > { %v627_v36 = vadd.f32 1.0, %v1343_v35 }
 0x8cd   : > { %1344 = vrcp.f32 %v627_v36 }
 0x8da   : > { %v1345_v37 = vpop.eup %1344 }
 0x8db   : > { %v635_v42 = vmul.f32 %v1345_v37, %v633_v40 }
 0x93b   : > { %v638_v38 = vpop.permute.xlu1 %637 }
 0x93c   : > { %v640_v39 = vmul.f32 %v1345_v37, %v638_v38 }
 0x93e   : > { %642 = vrot.lane.b32.xlu1 %v640_v39, %s1537_s5 }
 0x9b0   : > { %v643_v43 = vpop.permute.xlu1 %642 }
 0x9b1   : > { %v645_v44 = vadd.f32 %v643_v43, %v635_v42 }
 0x9b3   : > { %1346 = vtanh.f32 %v645_v44 }
 0x9c0   : > { %v1347_v46 = vpop.eup %1346 }
 0x9c1   : > { %648 = vrot.lane.b32.xlu0 %v1347_v46, %s1537_s5 }
 0xa33   : > { %v649_v48 = vpop.permute.xlu0 %648 }
 0xa34   : > { %v1882_v49 = vmul.f32 %v1345_v37, %v649_v48 }
 0xa36   : > { %659 = vperm.xlu0 %1284, %v1882_v49   ;;  %654 = vperm.xlu1 %1283, %v1882_v49  }
 0xa3a   : > { %1287 = vset.pattern.permute.xlu0 %v1567_v50  ;;  %1285 = vset.pattern.permute.xlu1 %v1568_v51  ;;  %v366_v51 = vpop.f32.mrf.mxu0 }
 0xa3b   : > { %674 = vperm.xlu0 %1287, %v1882_v49   ;;  %664 = vperm.xlu1 %1285, %v1882_v49  }
 0xa3f   : > { %1290 = vset.pattern.permute.xlu0 %v1569_v52  ;;  %1286 = vset.pattern.permute.xlu1 %v1570_v53 }
 0xa40   : > { %689 = vperm.xlu0 %1290, %v1882_v49   ;;  %669 = vperm.xlu1 %1286, %v1882_v49  }
 0xa44   : > { %1288 = vset.pattern.permute.xlu1 %v1571_v56  ;;  %1291 = vset.pattern.permute.xlu0 %v1539_v60  ;;  %v1905_v56 = vadd.f32 %v366_v51, %v291_v45 }
 0xa45   : > { %679 = vperm.xlu1 %1288, %v1882_v49  }
 0xa49   : > { %1289 = vset.pattern.permute.xlu1 %v1572_v57 }
 0xa4a   : > { %684 = vperm.xlu1 %1289, %v1882_v49  }
 0xa4e   : > { %1292 = vset.pattern.permute.xlu1 %v1538_v59 }
 0xab1   : > { %v655_v10 = vpop.permute.xlu1 %654  ;;  %v660_v16 = vpop.permute.xlu0 %659 }
 0xab2   : > { %v662_v37 = vmul.f32 %v660_v16, %v1756_v24  ;;  %v657_v60 = vmul.f32 %v655_v10, %v1748_v21 }
 0xab4   : > { %v693_v46 = vadd.f32 %v662_v37, %v657_v60 }
 0xab6   : > { %v665_v12 = vpop.permute.xlu1 %664  ;;  %v675_v33 = vpop.permute.xlu0 %674 }
 0xab7   : > { %v667_v38 = vmul.f32 %v665_v12, %v1750_v22  ;;  %v677_v59 = vmul.f32 %v675_v33, %v1758_v25 }
 0xabb   : > { %v670_v17 = vpop.permute.xlu1 %669  ;;  %v690_v36 = vpop.permute.xlu0 %689 }
 0xabc   : > { %v672_v35 = vmul.f32 %v670_v17, %v1752_v23  ;;  %v692_v42 = vmul.f32 %v690_v36, %v1764_v28 }
 0xabe   : > { %v694_v43 = vadd.f32 %v672_v35, %v667_v38 }
 0xac0   : > { %v680_v34 = vpop.permute.xlu1 %679  ;;  %v697_v52 = vadd.f32 %v694_v43, %v693_v46 }
 0xac1   : > { %v682_v39 = vmul.f32 %v680_v34, %v1760_v26 }
 0xac3   : > { %v695_v48 = vadd.f32 %v682_v39, %v677_v59 }
 0xac5   : > { %v685_v40 = vpop.permute.xlu1 %684 }
 0xac6   : > { %v687_v47 = vmul.f32 %v685_v40, %v1762_v27 }
 0xac8   : > { %v696_v50 = vadd.f32 %v692_v42, %v687_v47 }
 0xaca   : > { %v698_v53 = vadd.f32 %v696_v50, %v695_v48 }
 0xacc   : > { %v699_v57 = vadd.f32 %v698_v53, %v697_v52 }
 0xace   : > { %v700_v10 = vadd.f32 %v699_v57, %v1905_v56 }
 0xad0   : > { %1348 = vtanh.f32 %v700_v10  ;;  %v1138_v11 = vmul.f32 -1.442695, %v700_v10 }
 0xad2   : > { %1350 = vpow2.f32 %v1138_v11 }
 0xadd   : > { %v1349_v12 = vpop.eup %1348 }
 0xade   : > { %714 = vrot.lane.b32.xlu1 %v1349_v12, %s1536_s29 }
 0xadf   : > { %v1351_v15 = vpop.eup %1350 }
 0xae0   : > { %v704_v41 = vadd.f32 1.0, %v1351_v15 }
 0xae2   : > { %709 = vrot.lane.b32.xlu1 %v645_v44, %s1544_s6  ;;  %1352 = vrcp.f32 %v704_v41 }
 0xaef   : > { %v1353_v16 = vpop.eup %1352 }
 0xb50   : > { %v715_v17 = vpop.permute.xlu1 %714 }
 0xb51   : > { %v717_v33 = vmul.f32 %v1353_v16, %v715_v17 }
 0xb53   : > { %719 = vrot.lane.b32.xlu0 %v717_v33, %s1537_s5 }
 0xb54   : > { %v710_v34 = vpop.permute.xlu1 %709 }
 0xb55   : > { %v712_v35 = vmul.f32 %v1353_v16, %v710_v34 }
 0xbc5   : > { %v720_v36 = vpop.permute.xlu0 %719 }
 0xbc6   : > { %v722_v37 = vadd.f32 %v720_v36, %v712_v35 }
 0xbc8   : > { %1354 = vtanh.f32 %v722_v37 }
 0xbd5   : > { %v1355_v60 = vpop.eup %1354 }
 0xbd6   : > { %725 = vrot.lane.b32.xlu1 %v1355_v60, %s1537_s5 }
 0xc48   : > { %v726_v38 = vpop.permute.xlu1 %725 }
 0xc49   : > { %v1912_v44 = vmul.f32 %v1353_v16, %v726_v38 }
 0xc4b   : > { %736 = vperm.xlu1 %1292, %v1912_v44   ;;  %731 = vperm.xlu0 %1291, %v1912_v44  }
 0xc4f   : > { %1293 = vset.pattern.permute.xlu1 %v1541_v1  ;;  %1294 = vset.pattern.permute.xlu0 %v1543_v3 }
 0xc50   : > { %741 = vperm.xlu1 %1293, %v1912_v44   ;;  %746 = vperm.xlu0 %1294, %v1912_v44  }
 0xc54   : > { %1295 = vset.pattern.permute.xlu1 %v1540_v0  ;;  %1297 = vset.pattern.permute.xlu0 %v1546_v5 }
 0xc55   : > { %751 = vperm.xlu1 %1295, %v1912_v44   ;;  %761 = vperm.xlu0 %1297, %v1912_v44  }
 0xc59   : > { %1296 = vset.pattern.permute.xlu1 %v1545_v4  ;;  %1299 = vset.pattern.permute.xlu0 %v1548_v55 }
 0xc5a   : > { %756 = vperm.xlu1 %1296, %v1912_v44  }
 0xc5e   : > { %1298 = vset.pattern.permute.xlu1 %v1542_v2 }
 0xc5f   : > { %766 = vperm.xlu1 %1298, %v1912_v44  }
 0xc63   : > { %1300 = vset.pattern.permute.xlu1 %v1547_v54 }
 0xcc6   : > { %v737_v1 = vpop.permute.xlu1 %736  ;;  %v732_v3 = vpop.permute.xlu0 %731 }
 0xcc7   : > { %v739_v55 = vmul.f32 %v737_v1, %v1756_v24  ;;  %v734_v43 = vmul.f32 %v732_v3, %v1748_v21 }
 0xcc9   : > { %v770_v50 = vadd.f32 %v739_v55, %v734_v43 }
 0xccb   : > { %v742_v0 = vpop.permute.xlu1 %741  ;;  %v747_v39 = vpop.permute.xlu0 %746 }
 0xccc   : > { %v744_v59 = vmul.f32 %v742_v0, %v1750_v22  ;;  %v749_v4 = vmul.f32 %v747_v39, %v1752_v23 }
 0xcce   : > { %v771_v45 = vadd.f32 %v749_v4, %v744_v59 }
 0xcd0   : > { %v752_v5 = vpop.permute.xlu1 %751  ;;  %v762_v42 = vpop.permute.xlu0 %761  ;;  %v774_v53 = vadd.f32 %v771_v45, %v770_v50 }
 0xcd1   : > { %v754_v54 = vmul.f32 %v752_v5, %v1758_v25  ;;  %v764_v46 = vmul.f32 %v762_v42, %v1762_v27 }
 0xcd5   : > { %v757_v40 = vpop.permute.xlu1 %756 }
 0xcd6   : > { %v759_v2 = vmul.f32 %v757_v40, %v1760_v26 }
 0xcd8   : > { %v772_v51 = vadd.f32 %v759_v2, %v754_v54 }
 0xcda   : > { %v767_v47 = vpop.permute.xlu1 %766 }
 0xcdb   : > { %v769_v48 = vmul.f32 %v767_v47, %v1764_v28 }
 0xcdd   : > { %v773_v52 = vadd.f32 %v769_v48, %v764_v46 }
 0xcdf   : > { %v775_v57 = vadd.f32 %v773_v52, %v772_v51 }
 0xce1   : > { %v776_v10 = vadd.f32 %v775_v57, %v774_v53 }
 0xce3   : > { %778 = vrot.lane.b32.xlu1 %v776_v10, %s1544_s6 }
 0xce7   : > { %790 = vrot.lane.b32.xlu1 %v722_v37, %s1544_s6 }
 0xd55   : > { %v779_v12 = vpop.permute.xlu1 %778 }
 0xd56   : > { %v781_v11 = vadd.f32 %v779_v12, %v1905_v56 }
 0xd58   : > { %1356 = vtanh.f32 %v781_v11  ;;  %v1139_v41 = vmul.f32 -1.442695, %v781_v11 }
 0xd59   : > { %v791_v36 = vpop.permute.xlu1 %790 }
 0xd5a   : > { %1358 = vpow2.f32 %v1139_v41 }
 0xd65   : > { %v1357_v15 = vpop.eup %1356 }
 0xd66   : > { %795 = vrot.lane.b32.xlu0 %v1357_v15, %s1536_s29 }
 0xd67   : > { %v1359_v16 = vpop.eup %1358 }
 0xd68   : > { %v785_v17 = vadd.f32 1.0, %v1359_v16 }
 0xd6a   : > { %1360 = vrcp.f32 %v785_v17 }
 0xd77   : > { %v1361_v33 = vpop.eup %1360 }
 0xd78   : > { %v793_v60 = vmul.f32 %v1361_v33, %v791_v36 }
 0xdd8   : > { %v796_v34 = vpop.permute.xlu0 %795 }
 0xdd9   : > { %v798_v35 = vmul.f32 %v1361_v33, %v796_v34 }
 0xddb   : > { %800 = vrot.lane.b32.xlu0 %v798_v35, %s1537_s5 }
 0xe4d   : > { %v801_v37 = vpop.permute.xlu0 %800 }
 0xe4e   : > { %v803_v38 = vadd.f32 %v801_v37, %v793_v60 }
 0xe50   : > { %1362 = vtanh.f32 %v803_v38 }
 0xe5d   : > { %v1363_v1 = vpop.eup %1362 }
 0xe5e   : > { %806 = vrot.lane.b32.xlu1 %v1363_v1, %s1537_s5 }
 0xed0   : > { %v807_v0 = vpop.permute.xlu1 %806 }
 0xed1   : > { %v1944_v3 = vmul.f32 %v1361_v33, %v807_v0 }
 0xed3   : > { %817 = vperm.xlu1 %1300, %v1944_v3   ;;  %812 = vperm.xlu0 %1299, %v1944_v3  }
 0xed7   : > { %1301 = vset.pattern.permute.xlu1 %v1550_v62  ;;  %1302 = vset.pattern.permute.xlu0 %v1552_v7 }
 0xed8   : > { %822 = vperm.xlu1 %1301, %v1944_v3   ;;  %827 = vperm.xlu0 %1302, %v1944_v3  }
 0xedc   : > { %1303 = vset.pattern.permute.xlu1 %v1549_v61  ;;  %1305 = vset.pattern.permute.xlu0 %v1554_v9 }
 0xedd   : > { %832 = vperm.xlu1 %1303, %v1944_v3   ;;  %842 = vperm.xlu0 %1305, %v1944_v3  }
 0xee1   : > { %1304 = vset.pattern.permute.xlu1 %v1553_v8  ;;  %1307 = vset.pattern.permute.xlu0 %v1557_v14 }
 0xee2   : > { %837 = vperm.xlu1 %1304, %v1944_v3  }
 0xee6   : > { %1306 = vset.pattern.permute.xlu1 %v1551_v6 }
 0xee7   : > { %847 = vperm.xlu1 %1306, %v1944_v3  }
 0xeeb   : > { %1308 = vset.pattern.permute.xlu1 %v1556_v13 }
 0xf4e   : > { %v818_v62 = vpop.permute.xlu1 %817  ;;  %v813_v7 = vpop.permute.xlu0 %812 }
 0xf4f   : > { %v820_v14 = vmul.f32 %v818_v62, %v1756_v24  ;;  %v815_v4 = vmul.f32 %v813_v7, %v1748_v21 }
 0xf51   : > { %v851_v47 = vadd.f32 %v820_v14, %v815_v4 }
 0xf53   : > { %v823_v61 = vpop.permute.xlu1 %822  ;;  %v828_v5 = vpop.permute.xlu0 %827 }
 0xf54   : > { %v825_v40 = vmul.f32 %v823_v61, %v1750_v22  ;;  %v830_v8 = vmul.f32 %v828_v5, %v1752_v23 }
 0xf56   : > { %v852_v55 = vadd.f32 %v830_v8, %v825_v40 }
 0xf58   : > { %v833_v9 = vpop.permute.xlu1 %832  ;;  %v843_v59 = vpop.permute.xlu0 %842  ;;  %v855_v46 = vadd.f32 %v852_v55, %v851_v47 }
 0xf59   : > { %v835_v13 = vmul.f32 %v833_v9, %v1758_v25  ;;  %v845_v43 = vmul.f32 %v843_v59, %v1762_v27 }
 0xf5d   : > { %v838_v39 = vpop.permute.xlu1 %837 }
 0xf5e   : > { %v840_v6 = vmul.f32 %v838_v39, %v1760_v26 }
 0xf60   : > { %v853_v45 = vadd.f32 %v840_v6, %v835_v13 }
 0xf62   : > { %v848_v42 = vpop.permute.xlu1 %847 }
 0xf63   : > { %v850_v2 = vmul.f32 %v848_v42, %v1764_v28 }
 0xf65   : > { %v854_v54 = vadd.f32 %v850_v2, %v845_v43 }
 0xf67   : > { %v856_v48 = vadd.f32 %v854_v54, %v853_v45 }
 0xf69   : > { %v857_v50 = vadd.f32 %v856_v48, %v855_v46 }
 0xf6b   : > { %859 = vrot.lane.b32.xlu1 %v857_v50, %s1555_s7 }
 0xf6f   : > { %871 = vrot.lane.b32.xlu1 %v803_v38, %s1544_s6 }
 0xfdd   : > { %v860_v51 = vpop.permute.xlu1 %859 }
 0xfde   : > { %v862_v52 = vadd.f32 %v860_v51, %v1905_v56 }
 0xfe0   : > { %1364 = vtanh.f32 %v862_v52  ;;  %v1140_v57 = vmul.f32 -1.442695, %v862_v52 }
 0xfe1   : > { %v872_v16 = vpop.permute.xlu1 %871 }
 0xfe2   : > { %1366 = vpow2.f32 %v1140_v57 }
 0xfed   : > { %v1365_v53 = vpop.eup %1364 }
 0xfee   : > { %876 = vrot.lane.b32.xlu0 %v1365_v53, %s1536_s29 }
 0xfef   : > { %v1367_v10 = vpop.eup %1366 }
 0xff0   : > { %v866_v12 = vadd.f32 1.0, %v1367_v10 }
 0xff2   : > { %1368 = vrcp.f32 %v866_v12 }
 0xfff   : > { %v1369_v11 = vpop.eup %1368 }
0x1000   : > { %v874_v17 = vmul.f32 %v1369_v11, %v872_v16 }
0x1060   : > { %v877_v15 = vpop.permute.xlu0 %876 }
0x1061   : > { %v879_v41 = vmul.f32 %v1369_v11, %v877_v15 }
0x1063   : > { %881 = vrot.lane.b32.xlu0 %v879_v41, %s1537_s5 }
0x10d5   : > { %v882_v33 = vpop.permute.xlu0 %881 }
0x10d6   : > { %v884_v34 = vadd.f32 %v882_v33, %v874_v17 }
0x10d8   : > { %1370 = vtanh.f32 %v884_v34 }
0x10e5   : > { %v1371_v35 = vpop.eup %1370 }
0x10e6   : > { %887 = vrot.lane.b32.xlu1 %v1371_v35, %s1537_s5 }
0x1158   : > { %v888_v36 = vpop.permute.xlu1 %887 }
0x1159   : > { %v890_v60 = vmul.f32 %v1369_v11, %v888_v36 }
0x115b   : > { %898 = vperm.xlu1 %1308, %v890_v60   ;;  %893 = vperm.xlu0 %1307, %v890_v60  }
0x115f   : > { %1309 = vset.pattern.permute.xlu1 %v1559_v20  ;;  %1310 = vset.pattern.permute.xlu0 %v1561_v30 }
0x1160   : > { %903 = vperm.xlu1 %1309, %v890_v60   ;;  %908 = vperm.xlu0 %1310, %v890_v60  }
0x1164   : > { %1311 = vset.pattern.permute.xlu1 %v1558_v19  ;;  %1313 = vset.pattern.permute.xlu0 %v1563_v32 }
0x1165   : > { %913 = vperm.xlu1 %1311, %v890_v60   ;;  %923 = vperm.xlu0 %1313, %v890_v60  }
0x1169   : > { %1312 = vset.pattern.permute.xlu1 %v1562_v31  ;;  %1315 = vset.pattern.permute.xlu0 %v1560_v29 }
0x116a   : > { %918 = vperm.xlu1 %1312, %v890_v60  }
0x116e   : > { %1314 = vset.pattern.permute.xlu1 %v1560_v29 }
0x116f   : > { %928 = vperm.xlu1 %1314, %v890_v60  }
0x11d6   : > { %v899_v37 = vpop.permute.xlu1 %898  ;;  %v894_v38 = vpop.permute.xlu0 %893 }
0x11d7   : > { %v901_v61 = vmul.f32 %v899_v37, %v1756_v24  ;;  %v896_v31 = vmul.f32 %v894_v38, %v1748_v21 }
0x11d9   : > { %v932_v8 = vadd.f32 %v901_v61, %v896_v31 }
0x11db   : > { %v904_v20 = vpop.permute.xlu1 %903  ;;  %v909_v1 = vpop.permute.xlu0 %908 }
0x11dc   : > { %v906_v19 = vmul.f32 %v904_v20, %v1750_v22  ;;  %v911_v32 = vmul.f32 %v909_v1, %v1752_v23 }
0x11de   : > { %v933_v29 = vadd.f32 %v911_v32, %v906_v19 }
0x11e0   : > { %v914_v30 = vpop.permute.xlu1 %913  ;;  %v924_v62 = vpop.permute.xlu0 %923  ;;  %v936_v14 = vadd.f32 %v933_v29, %v932_v8 }
0x11e1   : > { %v916_v5 = vmul.f32 %v914_v30, %v1758_v25  ;;  %v926_v39 = vmul.f32 %v924_v62, %v1762_v27 }
0x11e5   : > { %v919_v0 = vpop.permute.xlu1 %918 }
0x11e6   : > { %v921_v7 = vmul.f32 %v919_v0, %v1760_v26 }
0x11e8   : > { %v934_v59 = vadd.f32 %v921_v7, %v916_v5 }
0x11ea   : > { %v929_v9 = vpop.permute.xlu1 %928 }
0x11eb   : > { %v931_v40 = vmul.f32 %v929_v9, %v1764_v28 }
0x11ed   : > { %v935_v22 = vadd.f32 %v931_v40, %v926_v39 }
0x11ef   : > { %v937_v23 = vadd.f32 %v935_v22, %v934_v59 }
0x11f1   : > { %v938_v4 = vadd.f32 %v937_v23, %v936_v14 }
0x11f3   : > { %940 = vrot.lane.b32.xlu1 %v938_v4, %s1564_s12 }
0x11f7   : > { %952 = vrot.lane.b32.xlu1 %v884_v34, %s1544_s6  ;;  %s1579_s6 = smov [#allocation8]  }
0x1265   : > { %v941_v21 = vpop.permute.xlu1 %940 }
0x1266   : > { %v943_v24 = vadd.f32 %v941_v21, %v1905_v56 }
0x1268   : > { %1372 = vtanh.f32 %v943_v24  ;;  %v1141_v25 = vmul.f32 -1.442695, %v943_v24 }
0x1269   : > { %v953_v56 = vpop.permute.xlu1 %952 }
0x126a   : > { %1374 = vpow2.f32 %v1141_v25 }
0x1275   : > { %v1373_v26 = vpop.eup %1372 }
0x1276   : > { %957 = vrot.lane.b32.xlu0 %v1373_v26, %s1536_s29 }
0x1277   : > { %v1375_v27 = vpop.eup %1374 }
0x1278   : > { %v947_v28 = vadd.f32 1.0, %v1375_v27 }
0x127a   : > { %1376 = vrcp.f32 %v947_v28 }
0x1287   : > { %v1377_v6 = vpop.eup %1376 }
0x1288   : > { %v955_v13 = vmul.f32 %v1377_v6, %v953_v56 }
0x12e8   : > { %v958_v42 = vpop.permute.xlu0 %957 }
0x12e9   : > { %v960_v55 = vmul.f32 %v1377_v6, %v958_v42 }
0x12eb   : > { %962 = vrot.lane.b32.xlu0 %v960_v55, %s1537_s5 }
0x12ef   : > { %972 = vrot.lane.b32.xlu0 %v1788_v63, %s1573_s13 }
0x12f3   : > { %978 = vrot.lane.b32.xlu0 %v1852_v18, %s1555_s7  ;;  %s1464_s7 = sshll.u32 %s1579_s6, 4  ;;  %s1465_s7 = int_to_ptr.vmem [resolvable:$false] %s1464_s7 }
0x12f4   : > { %p1467_p6 = scmp.lt.s32.totalorder %s2014_s21, %s1465_s7 }
0x12f7   : > { %984 = vrot.lane.b32.xlu0 %v1912_v44, %s1574_s25 }
0x12fb   : > { %990 = vrot.lane.b32.xlu0 %v890_v60, %s1564_s12  ;;  %s1466_s12 = scalar_lea.vmem %s1465_s7, 256 }
0x12fc   : > { %p1468_p12 = scmp.lt.s32.totalorder %s1466_s12, %s1460_s8 }
0x12fe   : > { %p1469_p7 = por %p1468_p12, %p1467_p6 }
0x1300   : > { %p1470_p9 = pnand %p1469_p7, %p1463_p2 }
0x135d   : > { %v963_v43 = vpop.permute.xlu0 %962 }
0x135e   : > { %v965_v2 = vadd.f32 %v963_v43, %v955_v13 }
0x1360   : > { %1378 = vtanh.f32 %v965_v2  ;;  %1013 = vrot.lane.b32.xlu0 %v965_v2, %s1575_s26 }
0x1361   : > { %v973_v44 = vpop.permute.xlu0 %972 }
0x1365   : > { %v979_v54 = vpop.permute.xlu0 %978 }
0x136d   : > { %v1379_v47 = vpop.eup %1378 }
0x136e   : > { %968 = vrot.lane.b32.xlu1 %v1379_v47, %s1537_s5  ;;  %s2012_s5 = scalar_lea.hbm %s2059_s4, %s1143_s9 }
0x1372   : > { %975 = vrot.lane.b32.xlu1 %v1820_v58, %s1575_s26  ;;  %v985_v58 = vpop.permute.xlu0 %984 }
0x1376   : > { %981 = vrot.lane.b32.xlu1 %v1882_v49, %s1576_s24  ;;  %v991_v53 = vpop.permute.xlu0 %990 }
0x137a   : > { %987 = vrot.lane.b32.xlu1 %v1944_v3, %s1577_s27 }
0x13d2   : > { %v1014_v11 = vpop.permute.xlu0 %1013 }
0x13e0   : > { %v969_v63 = vpop.permute.xlu1 %968 }
0x13e1   : > { %v971_v18 = vmul.f32 %v1377_v6, %v969_v63 }
0x13e3   : > { %994 = vrot.lane.b32.xlu1 %v971_v18, %s1578_s28 }
0x13e4   : > { %v976_v45 = vpop.permute.xlu1 %975 }
0x13e5   : > { %v998_v48 = vsel %vm997_vm1, %v973_v44, %v976_v45 }
0x13e6   : > { %v1000_v50 = vsel %vm999_vm2, %v998_v48, %v979_v54 }
0x13e8   : > { %v982_v46 = vpop.permute.xlu1 %981 }
0x13e9   : > { %v1002_v49 = vsel %vm1001_vm3, %v1000_v50, %v982_v46 }
0x13ea   : > { %v1003_v3 = vsel %vm294_vm0, %v1002_v49, %v985_v58 }
0x13ec   : > { %v988_v51 = vpop.permute.xlu1 %987 }
0x13ed   : > { %v1005_v52 = vsel %vm1004_vm4, %v1003_v3, %v988_v51 }
0x13ee   : > { %v1007_v57 = vsel %vm1006_vm5, %v1005_v52, %v991_v53 }
0x1455   : > { %v995_v10 = vpop.permute.xlu1 %994 }
0x1456   : > { %v1009_v12 = vsel %vm1008_vm6, %v1007_v57, %v995_v10 }
0x1457   : > { %1011 = vst.msk [vmem:[%s239_s10] sm:$0xff] %vm1010_vm7, %v1009_v12 }
0x1458   : > { %1017 = vst.msk [vmem:[%s239_s10] sm:$0xff] %vm1016_vm8, %v1014_v11 }
0x1459   : > { %1473 = shalt.err (!%p1470_p9)
}
0x145a   : > { %s1474_s13 = scalar_lea.hbm %s2012_s5, 128  ;;  %s1478_s26 = scalar_lea.hbm %s2059_s4, 256 }
0x145b   : > { %p1475_p13 = scmp.ne.s32.totalorder %s2012_s5, %s1474_s13  ;;  %p1479_p4 = scmp.lt.s32.totalorder %s2012_s5, %s2059_s4 }
0x145c   : > { %p1480_p8 = scmp.lt.s32.totalorder %s1478_s26, %s1474_s13 }
0x145d   : > { %p1476_p5 = pnand %p1475_p13, %p2075_p0 }
0x145e   : > { %p1481_p3 = por %p1480_p8, %p1479_p4 }
0x145f   : > { %p1477_p10 = pneg %p1476_p5 }
0x1461   : > { %p1482_p11 = pnand %p1481_p3, %p1477_p10 }
0x1463   : > { %1485 = shalt.err (!%p1482_p11)
}
0x1464   : > { %1156 = dma.vmem_to_hbm [thread:$0]  (%p2075_p0), %s2014_s21, 128, %s2012_s5, %s1019_s19  }
0x1465 PF: > { %s1044_s28 = sand.u32 1, %s1516_s15   ;;  %p2076_p1 = scmp.ne.s32.totalorder %s2065_s22, 0 }
0x1466   : > { %p2077_p2 = scmp.ge.s32.totalorder %s1528_s18, 2  ;;  %s1045_s9 = scalar_lea.sflag [#allocation4], %s1044_s28 }
0x1468   : > { %p1170_p6 = pnand %p2077_p2, %p2076_p1 }
0x146a   : > { %p1171_p12 = pneg %p1170_p6 }
0x146c   : > { %1511 = dma.done.wait (%p1171_p12), %s1045_s9, 128  }
0x146d   : > { %1513 = vsyncadd (%p1171_p12), %s1045_s9, 4294967168  ;;  %p18_p7 = scmp.ge.s32.totalorder %s1677_s11, 4   ;;  %s2078_s15 = smov %s1520_s16 }
0x146e   : > { %s2079_s16 = smov %s1524_s17  ;;  %s2080_s17 = smov %s1693_s20 }
0x146f   : > { %s2081_s18 = smov %s1677_s11  ;;  %20 = sbr.rel (!%p18_p7) target bundleno = 6 (0x6), region = 89 }
0x1474   :  { %1050 = vsyncpa [#allocation3], 1 }
0x1475   :  { %1052 = vsyncpa [#allocation3 + $0x1], 1 }
0x1476   :  { %1053 = vsyncpa [#allocation6], 1 }
0x1477   :  { %1054 = vsyncpa [#allocation4], 1 }
0x1478   :  { %1056 = vsyncpa [#allocation4 + $0x1], 1 }

</bundles_post_ra>
